<compile_context>
chip_gen: v7x
topology: tpu7x:2x2x1
jax: 0.10.0
libtpu: 0.0.40
codegen_flags: <defaults>
</compile_context>

<pallas_src>
import functools

import jax
import jax.numpy as jnp
from jax.experimental import pallas as pl
from jax.experimental.pallas import tpu as pltpu


# ------------------------------ pooling kernel ------------------------------
# torch.mean / torch.min / torch.max over dim=1 of (B, L, H) for both seqs,
# L-tiled with resident accumulators in the output block feats[stat, seq, b, :].
def _pool_kernel(h1_ref, h2_ref, feat_ref, *, L_total, lt, needs_mask):
    l = pl.program_id(1)
    nl = pl.num_programs(1)
    bt_blk = feat_ref.shape[2]
    h_dim = feat_ref.shape[3]

    @pl.when(l == 0)
    def _init():
        feat_ref[0, 0] = jnp.zeros((bt_blk, h_dim), feat_ref.dtype)
        feat_ref[0, 1] = jnp.zeros((bt_blk, h_dim), feat_ref.dtype)
        feat_ref[1, 0] = jnp.full((bt_blk, h_dim), jnp.inf, feat_ref.dtype)
        feat_ref[1, 1] = jnp.full((bt_blk, h_dim), jnp.inf, feat_ref.dtype)
        feat_ref[2, 0] = jnp.full((bt_blk, h_dim), -jnp.inf, feat_ref.dtype)
        feat_ref[2, 1] = jnp.full((bt_blk, h_dim), -jnp.inf, feat_ref.dtype)

    if needs_mask:
        # Mask the ragged final L tile so padded rows don't contaminate stats.
        pos = l * lt + jax.lax.broadcasted_iota(jnp.int32, (lt, 1), 0)
        valid = pos < L_total  # (lt, 1) broadcasts over (bt, lt, H)

    def update(h_ref, seq):
        x = h_ref[...]  # single load of the (bt, lt, H) tile; 3 accumulator updates
        if needs_mask:
            xs = jnp.where(valid, x, 0.0)
            xmn = jnp.where(valid, x, jnp.inf)
            xmx = jnp.where(valid, x, -jnp.inf)
        else:
            xs = xmn = xmx = x
        feat_ref[0, seq] = feat_ref[0, seq] + jnp.sum(xs, axis=1)
        feat_ref[1, seq] = jnp.minimum(feat_ref[1, seq], jnp.min(xmn, axis=1))
        feat_ref[2, seq] = jnp.maximum(feat_ref[2, seq], jnp.max(xmx, axis=1))

    update(h1_ref, 0)
    update(h2_ref, 1)

    @pl.when(l == nl - 1)
    def _finalize():
        inv_l = jnp.float32(1.0 / L_total)
        feat_ref[0, 0] = feat_ref[0, 0] * inv_l
        feat_ref[0, 1] = feat_ref[0, 1] * inv_l


def pool_pair(h1, h2, lt_override=None):
    B, L, H = h1.shape
    bt = min(B, 8)  # small batch tile -> B//bt >= 2 parallel steps on megacore
    if lt_override is not None:
        lt = min(L, lt_override)
    else:
        # Keep (2 inputs x 2 pipeline buffers x bt*lt*H*4B) under ~24 MB so the
        # pool tiles fit scoped VMEM on v5e/v6e and physical VMEM on v7x.
        budget = 24 * 1024 * 1024
        lt_cap = max(8, budget // (2 * 2 * bt * H * 4))
        lt = L if lt_cap >= L else max(8, (lt_cap // 8) * 8)
    needs_mask = (L % lt) != 0
    grid = (pl.cdiv(B, bt), pl.cdiv(L, lt))

    in_block = bt * lt * H * 4
    out_block = 3 * 2 * bt * H * 4
    vmem_bytes = int(1.3 * (2 * 2 * in_block + 2 * out_block)) + (1 << 20)

    kernel = functools.partial(_pool_kernel, L_total=L, lt=lt,
                               needs_mask=needs_mask)
    return pl.pallas_call(
        kernel,
        grid=grid,
        in_specs=[pl.BlockSpec((bt, lt, H), lambda b, l: (b, l, 0)),
                  pl.BlockSpec((bt, lt, H), lambda b, l: (b, l, 0))],
        out_specs=pl.BlockSpec((3, 2, bt, H), lambda b, l: (0, 0, b, 0)),
        out_shape=jax.ShapeDtypeStruct((3, 2, B, H), h1.dtype),
        compiler_params=pltpu.CompilerParams(
            dimension_semantics=("parallel", "arbitrary"),
            vmem_limit_bytes=vmem_bytes),
    )(h1, h2)


# -------------------------- fused prediction heads --------------------------
# grid=(3, B//btile) over {ave, min, max} heads x batch tiles; per-step
# BlockSpecs pick that head's pooled features and its BN-folded bf16 weights.
def _heads_kernel(feat_ref, w1a_ref, w1b_ref, b1_ref, w2_ref, b2_ref,
                  w3_ref, b3_ref, out_ref):
    x1 = feat_ref[0, 0].astype(jnp.bfloat16)          # (btile, H) pooled seq1
    x2 = feat_ref[0, 1].astype(jnp.bfloat16)          # (btile, H) pooled seq2
    # Linear(2H,1024)+BN folded; torch.cat replaced by split-W1 dots.
    h = (jnp.dot(x1, w1a_ref[0], preferred_element_type=jnp.float32)
         + jnp.dot(x2, w1b_ref[0], preferred_element_type=jnp.float32)
         + b1_ref[0])
    h = jnp.maximum(h, 0.0)
    # Linear(1024,256)+BN folded.
    h = jnp.dot(h.astype(jnp.bfloat16), w2_ref[0],
                preferred_element_type=jnp.float32) + b2_ref[0]
    h = jnp.maximum(h, 0.0)
    # Linear(256,1) as a VPU/XLU lane reduce (avoids N=1 MXU pass).
    logit = jnp.sum(h * w3_ref[0], axis=-1, keepdims=True) + b3_ref[0]
    out_ref[0] = jax.nn.sigmoid(logit)                # (btile, 1)


def predict_heads(feats, head_params):
    w1a, w1b, b1, w2, b2, w3, b3 = head_params
    n_heads, _, B, H = feats.shape
    d1 = w1a.shape[-1]
    d2 = w2.shape[-1]
    btile = min(B, 128)        # bound (btile,1024) f32 intermediate (no spills)
    nb = pl.cdiv(B, btile)

    blk_bytes = (2 * btile * H * 4             # feats block (f32)
                 + 2 * H * d1 * 2              # w1a + w1b (bf16)
                 + d1 * 4 + d1 * d2 * 2        # b1 (f32) + w2 (bf16)
                 + d2 * 4 + d2 * 4 + 4         # b2 + w3 + b3 (f32)
                 + btile * 4)                  # out block
    vmem_bytes = int(1.3 * 2 * blk_bytes) + (1 << 20)

    return pl.pallas_call(
        _heads_kernel,
        grid=(n_heads, nb),
        in_specs=[
            pl.BlockSpec((1, 2, btile, H), lambda h, b: (h, 0, b, 0)),  # feats
            pl.BlockSpec((1, H, d1), lambda h, b: (h, 0, 0)),           # w1a bf16
            pl.BlockSpec((1, H, d1), lambda h, b: (h, 0, 0)),           # w1b bf16
            pl.BlockSpec((1, 1, d1), lambda h, b: (h, 0, 0)),           # b1  f32
            pl.BlockSpec((1, d1, d2), lambda h, b: (h, 0, 0)),          # w2  bf16
            pl.BlockSpec((1, 1, d2), lambda h, b: (h, 0, 0)),           # b2  f32
            pl.BlockSpec((1, 1, d2), lambda h, b: (h, 0, 0)),           # w3  f32
            pl.BlockSpec((1, 1, 1), lambda h, b: (h, 0, 0)),            # b3  f32
        ],
        out_specs=pl.BlockSpec((1, btile, 1), lambda h, b: (h, b, 0)),
        out_shape=jax.ShapeDtypeStruct((n_heads, B, 1), jnp.float32),
        compiler_params=pltpu.CompilerParams(
            dimension_semantics=("parallel", "parallel"),
            vmem_limit_bytes=vmem_bytes),
    )(feats, w1a, w1b, b1, w2, b2, w3, b3)


# ------------------------------ parameter init ------------------------------
def init_head(key, d_in):
    k1, k2, k3, kb1, kb2 = jax.random.split(key, 5)

    def lin(k, din, dout):
        kw, kb = jax.random.split(k)
        w = jax.random.normal(kw, (din, dout), jnp.float32) / jnp.sqrt(
            jnp.float32(din))
        b = 0.01 * jax.random.normal(kb, (1, dout), jnp.float32)
        return w, b

    def bn(k, dout):
        kg, kb, km, kv = jax.random.split(k, 4)
        gamma = 1.0 + 0.1 * jax.random.normal(kg, (1, dout), jnp.float32)
        beta = 0.1 * jax.random.normal(kb, (1, dout), jnp.float32)
        mean = 0.1 * jax.random.normal(km, (1, dout), jnp.float32)
        var = 1.0 + 0.1 * jax.random.uniform(kv, (1, dout), jnp.float32)
        return gamma, beta, mean, var

    w1, b1 = lin(k1, d_in, 1024)
    g1, be1, m1, v1 = bn(kb1, 1024)
    w2, b2 = lin(k2, 1024, 256)
    g2, be2, m2, v2 = bn(kb2, 256)
    w3, b3 = lin(k3, 256, 1)
    return (w1, b1, g1, be1, m1, v1,
            w2, b2, g2, be2, m2, v2,
            w3, b3)


def _fold_head(params, eps=1e-5):
    """Fold eval-mode BatchNorm into the preceding Linear."""
    (w1, b1, g1, be1, m1, v1, w2, b2, g2, be2, m2, v2, w3, b3) = params
    s1 = g1 * jax.lax.rsqrt(v1 + eps)
    w1f, b1f = w1 * s1, b1 * s1 + (be1 - m1 * s1)
    s2 = g2 * jax.lax.rsqrt(v2 + eps)
    w2f, b2f = w2 * s2, b2 * s2 + (be2 - m2 * s2)
    return w1f, b1f, w2f, b2f, w3, b3


def stack_heads(params_ave, params_min, params_max, H):
    """BN-fold, split W1 per sequence, stack per head ([ave, min, max]), bf16."""
    folded = [_fold_head(p) for p in (params_ave, params_min, params_max)]
    w1f = jnp.stack([f[0] for f in folded])                       # (3, 2H, 1024)
    w1a = w1f[:, :H, :].astype(jnp.bfloat16)                      # (3, H, 1024)
    w1b = w1f[:, H:, :].astype(jnp.bfloat16)                      # (3, H, 1024)
    b1 = jnp.stack([f[1] for f in folded])                        # (3, 1, 1024)
    w2 = jnp.stack([f[2] for f in folded]).astype(jnp.bfloat16)   # (3, 1024, 256)
    b2 = jnp.stack([f[3] for f in folded])                        # (3, 1, 256)
    w3 = jnp.stack([f[4].reshape(1, -1) for f in folded])         # (3, 1, 256)
    b3 = jnp.stack([f[5].reshape(1, 1) for f in folded])          # (3, 1, 1)
    return w1a, w1b, b1, w2, b2, w3, b3


# --------------------------------- forward ----------------------------------
def deepnano_forward(h1, h2, head_params, lt_override=None):
    feats = pool_pair(h1, h2, lt_override)       # (3, 2, B, H)
    probs = predict_heads(feats, head_params)    # (3, B, 1)
    return probs[0], probs[1], probs[2]          # p_ave, p_min, p_max


# ------------------------------ pure-JAX reference ---------------------------
def _ref_forward(h1, h2, params_ave, params_min, params_max, eps=1e-5):
    def pool(h):
        return jnp.mean(h, 1), jnp.min(h, 1), jnp.max(h, 1)

    a1, n1, x1 = pool(h1)
    a2, n2, x2 = pool(h2)

    def head(x, p):
        (w1, b1, g1, be1, m1, v1, w2, b2, g2, be2, m2, v2, w3, b3) = p
        h = x @ w1 + b1
        h = (h - m1) * jax.lax.rsqrt(v1 + eps) * g1 + be1
        h = jnp.maximum(h, 0.0)
        h = h @ w2 + b2
        h = (h - m2) * jax.lax.rsqrt(v2 + eps) * g2 + be2
        h = jnp.maximum(h, 0.0)
        return jax.nn.sigmoid(h @ w3 + b3)

    return (head(jnp.concatenate([a1, a2], 1), params_ave),
            head(jnp.concatenate([n1, n2], 1), params_min),
            head(jnp.concatenate([x1, x2], 1), params_max))


if __name__ == "__main__":
    B, L, H = 2, 8, 32   # batch, seq len, hidden_size (small stand-in for 320)

    key = jax.random.PRNGKey(0)
    kh1, kh2, ka, kmi, kma, kl1, kl2 = jax.random.split(key, 7)
    # Stand-ins for pretrained_model(...).last_hidden_state of seq1 / seq2.
    h1 = jax.random.normal(kh1, (B, L, H), jnp.float32)
    h2 = jax.random.normal(kh2, (B, L, H), jnp.float32)

    params_ave = init_head(ka, 2 * H)
    params_min = init_head(kmi, 2 * H)
    params_max = init_head(kma, 2 * H)
    head_params = stack_heads(params_ave, params_min, params_max, H)

    fwd = jax.jit(deepnano_forward, static_argnums=(3,))
    p_ave, p_min, p_max = fwd(h1, h2, head_params, None)
    jax.block_until_ready((p_ave, p_min, p_max))

    assert p_ave.shape == (B, 1) and p_min.shape == (B, 1) and p_max.shape == (B, 1)
    assert bool(jnp.all((p_ave >= 0) & (p_ave <= 1)))

    # Loose check vs f32 reference (bf16 weights introduce small error).
    r_ave, r_min, r_max = _ref_forward(h1, h2, params_ave, params_min, params_max)
    for p, r in ((p_ave, r_ave), (p_min, r_min), (p_max, r_max)):
        assert float(jnp.max(jnp.abs(p - r))) < 5e-2

    # Second check exercising the L-tiled accumulator path incl. ragged tail
    # masking (L=20 with lt=8 -> 3 L steps, last one partially masked).
    L2 = 20
    g1 = jax.random.normal(kl1, (B, L2, H), jnp.float32)
    g2 = jax.random.normal(kl2, (B, L2, H), jnp.float32)
    q_ave, q_min, q_max = fwd(g1, g2, head_params, 8)
    jax.block_until_ready((q_ave, q_min, q_max))
    s_ave, s_min, s_max = _ref_forward(g1, g2, params_ave, params_min, params_max)
    for p, r in ((q_ave, s_ave), (q_min, s_min), (q_max, s_max)):
        assert float(jnp.max(jnp.abs(p - r))) < 5e-2

    print("KERNEL_OK")
</pallas_src>

<mosaic_0001>
module attributes {stable_mosaic.version = 11 : i64} {
  func.func @_heads_kernel(%arg0: i32, %arg1: i32, %arg2: memref<1x2x2x32xf32, #tpu.memory_space<vmem>>, %arg3: memref<1x32x1024xbf16, #tpu.memory_space<vmem>>, %arg4: memref<1x32x1024xbf16, #tpu.memory_space<vmem>>, %arg5: memref<1x1x1024xf32, #tpu.memory_space<vmem>>, %arg6: memref<1x1024x256xbf16, #tpu.memory_space<vmem>>, %arg7: memref<1x1x256xf32, #tpu.memory_space<vmem>>, %arg8: memref<1x1x256xf32, #tpu.memory_space<vmem>>, %arg9: memref<1x1x1xf32, #tpu.memory_space<vmem>>, %arg10: memref<1x2x1xf32, #tpu.memory_space<vmem>>) attributes {dimension_semantics = [#tpu.dimension_semantics<parallel>, #tpu.dimension_semantics<parallel>], iteration_bounds = array<i64: 3, 1>, scalar_prefetch = 0 : i64, scratch_operands = 0 : i64, tpu.core_type = #tpu.core_type<tc>, window_params = [{transform_indices = @transform_0, window_bounds = array<i64: 1, 2, 2, 32>}, {transform_indices = @transform_1, window_bounds = array<i64: 1, 32, 1024>}, {transform_indices = @transform_2, window_bounds = array<i64: 1, 32, 1024>}, {transform_indices = @transform_3, window_bounds = array<i64: 1, 1, 1024>}, {transform_indices = @transform_4, window_bounds = array<i64: 1, 1024, 256>}, {transform_indices = @transform_5, window_bounds = array<i64: 1, 1, 256>}, {transform_indices = @transform_6, window_bounds = array<i64: 1, 1, 256>}, {transform_indices = @transform_7, window_bounds = array<i64: 1, 1, 1>}, {transform_indices = @transform_8, window_bounds = array<i64: 1, 2, 1>}]} {
    %c0 = arith.constant 0 : index
    %c0_0 = arith.constant 0 : index
    %c0_1 = arith.constant 0 : index
    %c0_2 = arith.constant 0 : index
    %0 = vector.load %arg2[%c0, %c0_0, %c0_1, %c0_2] : memref<1x2x2x32xf32, #tpu.memory_space<vmem>>, vector<1x1x2x32xf32>
    %1 = vector.shape_cast %0 : vector<1x1x2x32xf32> to vector<2x32xf32>
    %2 = arith.truncf %1 : vector<2x32xf32> to vector<2x32xbf16>
    %c0_3 = arith.constant 0 : index
    %c1 = arith.constant 1 : index
    %c0_4 = arith.constant 0 : index
    %c0_5 = arith.constant 0 : index
    %3 = vector.load %arg2[%c0_3, %c1, %c0_4, %c0_5] : memref<1x2x2x32xf32, #tpu.memory_space<vmem>>, vector<1x1x2x32xf32>
    %4 = vector.shape_cast %3 : vector<1x1x2x32xf32> to vector<2x32xf32>
    %5 = arith.truncf %4 : vector<2x32xf32> to vector<2x32xbf16>
    %c0_6 = arith.constant 0 : index
    %c0_7 = arith.constant 0 : index
    %c0_8 = arith.constant 0 : index
    %6 = vector.load %arg3[%c0_6, %c0_7, %c0_8] : memref<1x32x1024xbf16, #tpu.memory_space<vmem>>, vector<1x32x1024xbf16>
    %7 = vector.shape_cast %6 : vector<1x32x1024xbf16> to vector<32x1024xbf16>
    %cst = arith.constant dense<0.000000e+00> : vector<2x1024xf32>
    %8 = tpu.matmul %2, %7, %cst {dimension_numbers = #tpu.dot_dimension_numbers<[1], [0], [0], [1], [0, 0, 1, 1], [], []>} : vector<2x32xbf16>, vector<32x1024xbf16>, vector<2x1024xf32> -> vector<2x1024xf32>
    %c0_9 = arith.constant 0 : index
    %c0_10 = arith.constant 0 : index
    %c0_11 = arith.constant 0 : index
    %9 = vector.load %arg4[%c0_9, %c0_10, %c0_11] : memref<1x32x1024xbf16, #tpu.memory_space<vmem>>, vector<1x32x1024xbf16>
    %10 = vector.shape_cast %9 : vector<1x32x1024xbf16> to vector<32x1024xbf16>
    %cst_12 = arith.constant dense<0.000000e+00> : vector<2x1024xf32>
    %11 = tpu.matmul %5, %10, %cst_12 {dimension_numbers = #tpu.dot_dimension_numbers<[1], [0], [0], [1], [0, 0, 1, 1], [], []>} : vector<2x32xbf16>, vector<32x1024xbf16>, vector<2x1024xf32> -> vector<2x1024xf32>
    %12 = arith.addf %8, %11 : vector<2x1024xf32>
    %c0_13 = arith.constant 0 : index
    %c0_14 = arith.constant 0 : index
    %c0_15 = arith.constant 0 : index
    %13 = vector.load %arg5[%c0_13, %c0_14, %c0_15] : memref<1x1x1024xf32, #tpu.memory_space<vmem>>, vector<1x1x1024xf32>
    %14 = vector.shape_cast %13 : vector<1x1x1024xf32> to vector<1x1024xf32>
    %15 = vector.broadcast %14 : vector<1x1024xf32> to vector<2x1024xf32>
    %16 = arith.addf %12, %15 : vector<2x1024xf32>
    %cst_16 = arith.constant 0.000000e+00 : f32
    %17 = vector.broadcast %cst_16 : f32 to vector<2x1024xf32>
    %18 = arith.maximumf %16, %17 : vector<2x1024xf32>
    %19 = arith.truncf %18 : vector<2x1024xf32> to vector<2x1024xbf16>
    %c0_17 = arith.constant 0 : index
    %c0_18 = arith.constant 0 : index
    %c0_19 = arith.constant 0 : index
    %20 = vector.load %arg6[%c0_17, %c0_18, %c0_19] : memref<1x1024x256xbf16, #tpu.memory_space<vmem>>, vector<1x1024x256xbf16>
    %21 = vector.shape_cast %20 : vector<1x1024x256xbf16> to vector<1024x256xbf16>
    %cst_20 = arith.constant dense<0.000000e+00> : vector<2x256xf32>
    %22 = tpu.matmul %19, %21, %cst_20 {dimension_numbers = #tpu.dot_dimension_numbers<[1], [0], [0], [1], [0, 0, 1, 1], [], []>} : vector<2x1024xbf16>, vector<1024x256xbf16>, vector<2x256xf32> -> vector<2x256xf32>
    %c0_21 = arith.constant 0 : index
    %c0_22 = arith.constant 0 : index
    %c0_23 = arith.constant 0 : index
    %23 = vector.load %arg7[%c0_21, %c0_22, %c0_23] : memref<1x1x256xf32, #tpu.memory_space<vmem>>, vector<1x1x256xf32>
    %24 = vector.shape_cast %23 : vector<1x1x256xf32> to vector<1x256xf32>
    %25 = vector.broadcast %24 : vector<1x256xf32> to vector<2x256xf32>
    %26 = arith.addf %22, %25 : vector<2x256xf32>
    %cst_24 = arith.constant 0.000000e+00 : f32
    %27 = vector.broadcast %cst_24 : f32 to vector<2x256xf32>
    %28 = arith.maximumf %26, %27 : vector<2x256xf32>
    %c0_25 = arith.constant 0 : index
    %c0_26 = arith.constant 0 : index
    %c0_27 = arith.constant 0 : index
    %29 = vector.load %arg8[%c0_25, %c0_26, %c0_27] : memref<1x1x256xf32, #tpu.memory_space<vmem>>, vector<1x1x256xf32>
    %30 = vector.shape_cast %29 : vector<1x1x256xf32> to vector<1x256xf32>
    %31 = vector.broadcast %30 : vector<1x256xf32> to vector<2x256xf32>
    %32 = arith.mulf %28, %31 : vector<2x256xf32>
    %cst_28 = arith.constant dense<0.000000e+00> : vector<2xf32>
    %33 = vector.multi_reduction <add>, %32, %cst_28 [1] : vector<2x256xf32> to vector<2xf32>
    %34 = vector.shape_cast %33 : vector<2xf32> to vector<2x1xf32>
    %c0_29 = arith.constant 0 : index
    %c0_30 = arith.constant 0 : index
    %c0_31 = arith.constant 0 : index
    %35 = vector.load %arg9[%c0_29, %c0_30, %c0_31] : memref<1x1x1xf32, #tpu.memory_space<vmem>>, vector<1x1x1xf32>
    %36 = vector.shape_cast %35 : vector<1x1x1xf32> to vector<1x1xf32>
    %37 = vector.broadcast %36 : vector<1x1xf32> to vector<2x1xf32>
    %38 = arith.addf %34, %37 : vector<2x1xf32>
    %39 = arith.negf %38 : vector<2x1xf32>
    %40 = math.exp %39 : vector<2x1xf32>
    %cst_32 = arith.constant 1.000000e+00 : f32
    %41 = vector.broadcast %cst_32 : f32 to vector<2x1xf32>
    %42 = arith.addf %41, %40 : vector<2x1xf32>
    %43 = arith.divf %41, %42 : vector<2x1xf32>
    %c0_33 = arith.constant 0 : index
    %c0_34 = arith.constant 0 : index
    %c0_35 = arith.constant 0 : index
    %44 = vector.load %arg10[%c0_33, %c0_34, %c0_35] : memref<1x2x1xf32, #tpu.memory_space<vmem>>, vector<1x2x1xf32>
    %45 = vector.shape_cast %44 : vector<1x2x1xf32> to vector<2x1xf32>
    %46 = vector.shape_cast %43 : vector<2x1xf32> to vector<1x2x1xf32>
    tpu.vector_store %arg10[%c0_33, %c0_34, %c0_35], %46 {strides = array<i32>} : memref<1x2x1xf32, #tpu.memory_space<vmem>>, vector<1x2x1xf32>,
    return
  }
  func.func @transform_0(%arg0: i32, %arg1: i32) -> (i32, i32, i32, i32) {
    %c0_i32 = arith.constant 0 : i32
    %c0_i32_0 = arith.constant 0 : i32
    %c0_i32_1 = arith.constant 0 : i32
    return %arg0, %c0_i32, %arg1, %c0_i32_0 : i32, i32, i32, i32
  }
  func.func @transform_1(%arg0: i32, %arg1: i32) -> (i32, i32, i32) {
    %c0_i32 = arith.constant 0 : i32
    %c0_i32_0 = arith.constant 0 : i32
    %c0_i32_1 = arith.constant 0 : i32
    return %arg0, %c0_i32, %c0_i32_0 : i32, i32, i32
  }
  func.func @transform_2(%arg0: i32, %arg1: i32) -> (i32, i32, i32) {
    %c0_i32 = arith.constant 0 : i32
    %c0_i32_0 = arith.constant 0 : i32
    %c0_i32_1 = arith.constant 0 : i32
    return %arg0, %c0_i32, %c0_i32_0 : i32, i32, i32
  }
  func.func @transform_3(%arg0: i32, %arg1: i32) -> (i32, i32, i32) {
    %c0_i32 = arith.constant 0 : i32
    %c0_i32_0 = arith.constant 0 : i32
    %c0_i32_1 = arith.constant 0 : i32
    return %arg0, %c0_i32, %c0_i32_0 : i32, i32, i32
  }
  func.func @transform_4(%arg0: i32, %arg1: i32) -> (i32, i32, i32) {
    %c0_i32 = arith.constant 0 : i32
    %c0_i32_0 = arith.constant 0 : i32
    %c0_i32_1 = arith.constant 0 : i32
    return %arg0, %c0_i32, %c0_i32_0 : i32, i32, i32
  }
  func.func @transform_5(%arg0: i32, %arg1: i32) -> (i32, i32, i32) {
    %c0_i32 = arith.constant 0 : i32
    %c0_i32_0 = arith.constant 0 : i32
    %c0_i32_1 = arith.constant 0 : i32
    return %arg0, %c0_i32, %c0_i32_0 : i32, i32, i32
  }
  func.func @transform_6(%arg0: i32, %arg1: i32) -> (i32, i32, i32) {
    %c0_i32 = arith.constant 0 : i32
    %c0_i32_0 = arith.constant 0 : i32
    %c0_i32_1 = arith.constant 0 : i32
    return %arg0, %c0_i32, %c0_i32_0 : i32, i32, i32
  }
  func.func @transform_7(%arg0: i32, %arg1: i32) -> (i32, i32, i32) {
    %c0_i32 = arith.constant 0 : i32
    %c0_i32_0 = arith.constant 0 : i32
    %c0_i32_1 = arith.constant 0 : i32
    return %arg0, %c0_i32, %c0_i32_0 : i32, i32, i32
  }
  func.func @transform_8(%arg0: i32, %arg1: i32) -> (i32, i32, i32) {
    %c0_i32 = arith.constant 0 : i32
    %c0_i32_0 = arith.constant 0 : i32
    return %arg0, %arg1, %c0_i32 : i32, i32, i32
  }
}

module attributes {stable_mosaic.version = 11 : i64} {
  func.func @_pool_kernel(%arg0: i32, %arg1: i32, %arg2: memref<2x8x32xf32, #tpu.memory_space<vmem>>, %arg3: memref<2x8x32xf32, #tpu.memory_space<vmem>>, %arg4: memref<3x2x2x32xf32, #tpu.memory_space<vmem>>) attributes {dimension_semantics = [#tpu.dimension_semantics<parallel>, #tpu.dimension_semantics<arbitrary>], iteration_bounds = array<i64: 1, 1>, scalar_prefetch = 0 : i64, scratch_operands = 0 : i64, tpu.core_type = #tpu.core_type<tc>, window_params = [{transform_indices = @transform_0, window_bounds = array<i64: 2, 8, 32>}, {transform_indices = @transform_1, window_bounds = array<i64: 2, 8, 32>}, {transform_indices = @transform_2, window_bounds = array<i64: 3, 2, 2, 32>}]} {
    %c0_i32 = arith.constant 0 : i32
    %0 = arith.cmpi eq, %arg1, %c0_i32 : i32
    %1 = arith.extui %0 : i1 to i32
    %c0_i32_0 = arith.constant 0 : i32
    %2 = arith.cmpi ne, %1, %c0_i32_0 : i32
    scf.if %2 {
      %cst_59 = arith.constant 0.000000e+00 : f32
      %50 = vector.broadcast %cst_59 : f32 to vector<2x32xf32>
      %c0_60 = arith.constant 0 : index
      %c0_61 = arith.constant 0 : index
      %c0_62 = arith.constant 0 : index
      %c0_63 = arith.constant 0 : index
      %51 = vector.load %arg4[%c0_60, %c0_61, %c0_62, %c0_63] : memref<3x2x2x32xf32, #tpu.memory_space<vmem>>, vector<1x1x2x32xf32>
      %52 = vector.shape_cast %51 : vector<1x1x2x32xf32> to vector<2x32xf32>
      %53 = vector.shape_cast %50 : vector<2x32xf32> to vector<1x1x2x32xf32>
      tpu.vector_store %arg4[%c0_60, %c0_61, %c0_62, %c0_63], %53 {strides = array<i32>} : memref<3x2x2x32xf32, #tpu.memory_space<vmem>>, vector<1x1x2x32xf32>,
      %cst_64 = arith.constant 0.000000e+00 : f32
      %54 = vector.broadcast %cst_64 : f32 to vector<2x32xf32>
      %c0_65 = arith.constant 0 : index
      %c1_66 = arith.constant 1 : index
      %c0_67 = arith.constant 0 : index
      %c0_68 = arith.constant 0 : index
      %55 = vector.load %arg4[%c0_65, %c1_66, %c0_67, %c0_68] : memref<3x2x2x32xf32, #tpu.memory_space<vmem>>, vector<1x1x2x32xf32>
      %56 = vector.shape_cast %55 : vector<1x1x2x32xf32> to vector<2x32xf32>
      %57 = vector.shape_cast %54 : vector<2x32xf32> to vector<1x1x2x32xf32>
      tpu.vector_store %arg4[%c0_65, %c1_66, %c0_67, %c0_68], %57 {strides = array<i32>} : memref<3x2x2x32xf32, #tpu.memory_space<vmem>>, vector<1x1x2x32xf32>,
      %cst_69 = arith.constant 0x7F800000 : f32
      %58 = vector.broadcast %cst_69 : f32 to vector<2x32xf32>
      %c1_70 = arith.constant 1 : index
      %c0_71 = arith.constant 0 : index
      %c0_72 = arith.constant 0 : index
      %c0_73 = arith.constant 0 : index
      %59 = vector.load %arg4[%c1_70, %c0_71, %c0_72, %c0_73] : memref<3x2x2x32xf32, #tpu.memory_space<vmem>>, vector<1x1x2x32xf32>
      %60 = vector.shape_cast %59 : vector<1x1x2x32xf32> to vector<2x32xf32>
      %61 = vector.shape_cast %58 : vector<2x32xf32> to vector<1x1x2x32xf32>
      tpu.vector_store %arg4[%c1_70, %c0_71, %c0_72, %c0_73], %61 {strides = array<i32>} : memref<3x2x2x32xf32, #tpu.memory_space<vmem>>, vector<1x1x2x32xf32>,
      %cst_74 = arith.constant 0x7F800000 : f32
      %62 = vector.broadcast %cst_74 : f32 to vector<2x32xf32>
      %c1_75 = arith.constant 1 : index
      %c1_76 = arith.constant 1 : index
      %c0_77 = arith.constant 0 : index
      %c0_78 = arith.constant 0 : index
      %63 = vector.load %arg4[%c1_75, %c1_76, %c0_77, %c0_78] : memref<3x2x2x32xf32, #tpu.memory_space<vmem>>, vector<1x1x2x32xf32>
      %64 = vector.shape_cast %63 : vector<1x1x2x32xf32> to vector<2x32xf32>
      %65 = vector.shape_cast %62 : vector<2x32xf32> to vector<1x1x2x32xf32>
      tpu.vector_store %arg4[%c1_75, %c1_76, %c0_77, %c0_78], %65 {strides = array<i32>} : memref<3x2x2x32xf32, #tpu.memory_space<vmem>>, vector<1x1x2x32xf32>,
      %cst_79 = arith.constant 0xFF800000 : f32
      %66 = vector.broadcast %cst_79 : f32 to vector<2x32xf32>
      %c2_80 = arith.constant 2 : index
      %c0_81 = arith.constant 0 : index
      %c0_82 = arith.constant 0 : index
      %c0_83 = arith.constant 0 : index
      %67 = vector.load %arg4[%c2_80, %c0_81, %c0_82, %c0_83] : memref<3x2x2x32xf32, #tpu.memory_space<vmem>>, vector<1x1x2x32xf32>
      %68 = vector.shape_cast %67 : vector<1x1x2x32xf32> to vector<2x32xf32>
      %69 = vector.shape_cast %66 : vector<2x32xf32> to vector<1x1x2x32xf32>
      tpu.vector_store %arg4[%c2_80, %c0_81, %c0_82, %c0_83], %69 {strides = array<i32>} : memref<3x2x2x32xf32, #tpu.memory_space<vmem>>, vector<1x1x2x32xf32>,
      %cst_84 = arith.constant 0xFF800000 : f32
      %70 = vector.broadcast %cst_84 : f32 to vector<2x32xf32>
      %c2_85 = arith.constant 2 : index
      %c1_86 = arith.constant 1 : index
      %c0_87 = arith.constant 0 : index
      %c0_88 = arith.constant 0 : index
      %71 = vector.load %arg4[%c2_85, %c1_86, %c0_87, %c0_88] : memref<3x2x2x32xf32, #tpu.memory_space<vmem>>, vector<1x1x2x32xf32>
      %72 = vector.shape_cast %71 : vector<1x1x2x32xf32> to vector<2x32xf32>
      %73 = vector.shape_cast %70 : vector<2x32xf32> to vector<1x1x2x32xf32>
      tpu.vector_store %arg4[%c2_85, %c1_86, %c0_87, %c0_88], %73 {strides = array<i32>} : memref<3x2x2x32xf32, #tpu.memory_space<vmem>>, vector<1x1x2x32xf32>,
    } else {
    }
    %c0 = arith.constant 0 : index
    %c0_1 = arith.constant 0 : index
    %c0_2 = arith.constant 0 : index
    %3 = vector.load %arg2[%c0, %c0_1, %c0_2] : memref<2x8x32xf32, #tpu.memory_space<vmem>>, vector<2x8x32xf32>
    %c0_3 = arith.constant 0 : index
    %c0_4 = arith.constant 0 : index
    %c0_5 = arith.constant 0 : index
    %c0_6 = arith.constant 0 : index
    %4 = vector.load %arg4[%c0_3, %c0_4, %c0_5, %c0_6] : memref<3x2x2x32xf32, #tpu.memory_space<vmem>>, vector<1x1x2x32xf32>
    %5 = vector.shape_cast %4 : vector<1x1x2x32xf32> to vector<2x32xf32>
    %cst = arith.constant dense<0.000000e+00> : vector<2x32xf32>
    %6 = vector.multi_reduction <add>, %3, %cst [1] : vector<2x8x32xf32> to vector<2x32xf32>
    %7 = arith.addf %5, %6 : vector<2x32xf32>
    %c0_7 = arith.constant 0 : index
    %c0_8 = arith.constant 0 : index
    %c0_9 = arith.constant 0 : index
    %c0_10 = arith.constant 0 : index
    %8 = vector.load %arg4[%c0_7, %c0_8, %c0_9, %c0_10] : memref<3x2x2x32xf32, #tpu.memory_space<vmem>>, vector<1x1x2x32xf32>
    %9 = vector.shape_cast %8 : vector<1x1x2x32xf32> to vector<2x32xf32>
    %10 = vector.shape_cast %7 : vector<2x32xf32> to vector<1x1x2x32xf32>
    tpu.vector_store %arg4[%c0_7, %c0_8, %c0_9, %c0_10], %10 {strides = array<i32>} : memref<3x2x2x32xf32, #tpu.memory_space<vmem>>, vector<1x1x2x32xf32>,
    %c1 = arith.constant 1 : index
    %c0_11 = arith.constant 0 : index
    %c0_12 = arith.constant 0 : index
    %c0_13 = arith.constant 0 : index
    %11 = vector.load %arg4[%c1, %c0_11, %c0_12, %c0_13] : memref<3x2x2x32xf32, #tpu.memory_space<vmem>>, vector<1x1x2x32xf32>
    %12 = vector.shape_cast %11 : vector<1x1x2x32xf32> to vector<2x32xf32>
    %cst_14 = arith.constant dense<0x7F800000> : vector<2x32xf32>
    %13 = vector.multi_reduction <minimumf>, %3, %cst_14 [1] : vector<2x8x32xf32> to vector<2x32xf32>
    %14 = arith.minimumf %12, %13 : vector<2x32xf32>
    %c1_15 = arith.constant 1 : index
    %c0_16 = arith.constant 0 : index
    %c0_17 = arith.constant 0 : index
    %c0_18 = arith.constant 0 : index
    %15 = vector.load %arg4[%c1_15, %c0_16, %c0_17, %c0_18] : memref<3x2x2x32xf32, #tpu.memory_space<vmem>>, vector<1x1x2x32xf32>
    %16 = vector.shape_cast %15 : vector<1x1x2x32xf32> to vector<2x32xf32>
    %17 = vector.shape_cast %14 : vector<2x32xf32> to vector<1x1x2x32xf32>
    tpu.vector_store %arg4[%c1_15, %c0_16, %c0_17, %c0_18], %17 {strides = array<i32>} : memref<3x2x2x32xf32, #tpu.memory_space<vmem>>, vector<1x1x2x32xf32>,
    %c2 = arith.constant 2 : index
    %c0_19 = arith.constant 0 : index
    %c0_20 = arith.constant 0 : index
    %c0_21 = arith.constant 0 : index
    %18 = vector.load %arg4[%c2, %c0_19, %c0_20, %c0_21] : memref<3x2x2x32xf32, #tpu.memory_space<vmem>>, vector<1x1x2x32xf32>
    %19 = vector.shape_cast %18 : vector<1x1x2x32xf32> to vector<2x32xf32>
    %cst_22 = arith.constant dense<0xFF800000> : vector<2x32xf32>
    %20 = vector.multi_reduction <maximumf>, %3, %cst_22 [1] : vector<2x8x32xf32> to vector<2x32xf32>
    %21 = arith.maximumf %19, %20 : vector<2x32xf32>
    %c2_23 = arith.constant 2 : index
    %c0_24 = arith.constant 0 : index
    %c0_25 = arith.constant 0 : index
    %c0_26 = arith.constant 0 : index
    %22 = vector.load %arg4[%c2_23, %c0_24, %c0_25, %c0_26] : memref<3x2x2x32xf32, #tpu.memory_space<vmem>>, vector<1x1x2x32xf32>
    %23 = vector.shape_cast %22 : vector<1x1x2x32xf32> to vector<2x32xf32>
    %24 = vector.shape_cast %21 : vector<2x32xf32> to vector<1x1x2x32xf32>
    tpu.vector_store %arg4[%c2_23, %c0_24, %c0_25, %c0_26], %24 {strides = array<i32>} : memref<3x2x2x32xf32, #tpu.memory_space<vmem>>, vector<1x1x2x32xf32>,
    %c0_27 = arith.constant 0 : index
    %c0_28 = arith.constant 0 : index
    %c0_29 = arith.constant 0 : index
    %25 = vector.load %arg3[%c0_27, %c0_28, %c0_29] : memref<2x8x32xf32, #tpu.memory_space<vmem>>, vector<2x8x32xf32>
    %c0_30 = arith.constant 0 : index
    %c1_31 = arith.constant 1 : index
    %c0_32 = arith.constant 0 : index
    %c0_33 = arith.constant 0 : index
    %26 = vector.load %arg4[%c0_30, %c1_31, %c0_32, %c0_33] : memref<3x2x2x32xf32, #tpu.memory_space<vmem>>, vector<1x1x2x32xf32>
    %27 = vector.shape_cast %26 : vector<1x1x2x32xf32> to vector<2x32xf32>
    %cst_34 = arith.constant dense<0.000000e+00> : vector<2x32xf32>
    %28 = vector.multi_reduction <add>, %25, %cst_34 [1] : vector<2x8x32xf32> to vector<2x32xf32>
    %29 = arith.addf %27, %28 : vector<2x32xf32>
    %c0_35 = arith.constant 0 : index
    %c1_36 = arith.constant 1 : index
    %c0_37 = arith.constant 0 : index
    %c0_38 = arith.constant 0 : index
    %30 = vector.load %arg4[%c0_35, %c1_36, %c0_37, %c0_38] : memref<3x2x2x32xf32, #tpu.memory_space<vmem>>, vector<1x1x2x32xf32>
    %31 = vector.shape_cast %30 : vector<1x1x2x32xf32> to vector<2x32xf32>
    %32 = vector.shape_cast %29 : vector<2x32xf32> to vector<1x1x2x32xf32>
    tpu.vector_store %arg4[%c0_35, %c1_36, %c0_37, %c0_38], %32 {strides = array<i32>} : memref<3x2x2x32xf32, #tpu.memory_space<vmem>>, vector<1x1x2x32xf32>,
    %c1_39 = arith.constant 1 : index
    %c1_40 = arith.constant 1 : index
    %c0_41 = arith.constant 0 : index
    %c0_42 = arith.constant 0 : index
    %33 = vector.load %arg4[%c1_39, %c1_40, %c0_41, %c0_42] : memref<3x2x2x32xf32, #tpu.memory_space<vmem>>, vector<1x1x2x32xf32>
    %34 = vector.shape_cast %33 : vector<1x1x2x32xf32> to vector<2x32xf32>
    %cst_43 = arith.constant dense<0x7F800000> : vector<2x32xf32>
    %35 = vector.multi_reduction <minimumf>, %25, %cst_43 [1] : vector<2x8x32xf32> to vector<2x32xf32>
    %36 = arith.minimumf %34, %35 : vector<2x32xf32>
    %c1_44 = arith.constant 1 : index
    %c1_45 = arith.constant 1 : index
    %c0_46 = arith.constant 0 : index
    %c0_47 = arith.constant 0 : index
    %37 = vector.load %arg4[%c1_44, %c1_45, %c0_46, %c0_47] : memref<3x2x2x32xf32, #tpu.memory_space<vmem>>, vector<1x1x2x32xf32>
    %38 = vector.shape_cast %37 : vector<1x1x2x32xf32> to vector<2x32xf32>
    %39 = vector.shape_cast %36 : vector<2x32xf32> to vector<1x1x2x32xf32>
    tpu.vector_store %arg4[%c1_44, %c1_45, %c0_46, %c0_47], %39 {strides = array<i32>} : memref<3x2x2x32xf32, #tpu.memory_space<vmem>>, vector<1x1x2x32xf32>,
    %c2_48 = arith.constant 2 : index
    %c1_49 = arith.constant 1 : index
    %c0_50 = arith.constant 0 : index
    %c0_51 = arith.constant 0 : index
    %40 = vector.load %arg4[%c2_48, %c1_49, %c0_50, %c0_51] : memref<3x2x2x32xf32, #tpu.memory_space<vmem>>, vector<1x1x2x32xf32>
    %41 = vector.shape_cast %40 : vector<1x1x2x32xf32> to vector<2x32xf32>
    %cst_52 = arith.constant dense<0xFF800000> : vector<2x32xf32>
    %42 = vector.multi_reduction <maximumf>, %25, %cst_52 [1] : vector<2x8x32xf32> to vector<2x32xf32>
    %43 = arith.maximumf %41, %42 : vector<2x32xf32>
    %c2_53 = arith.constant 2 : index
    %c1_54 = arith.constant 1 : index
    %c0_55 = arith.constant 0 : index
    %c0_56 = arith.constant 0 : index
    %44 = vector.load %arg4[%c2_53, %c1_54, %c0_55, %c0_56] : memref<3x2x2x32xf32, #tpu.memory_space<vmem>>, vector<1x1x2x32xf32>
    %45 = vector.shape_cast %44 : vector<1x1x2x32xf32> to vector<2x32xf32>
    %46 = vector.shape_cast %43 : vector<2x32xf32> to vector<1x1x2x32xf32>
    tpu.vector_store %arg4[%c2_53, %c1_54, %c0_55, %c0_56], %46 {strides = array<i32>} : memref<3x2x2x32xf32, #tpu.memory_space<vmem>>, vector<1x1x2x32xf32>,
    %c0_i32_57 = arith.constant 0 : i32
    %47 = arith.cmpi eq, %arg1, %c0_i32_57 : i32
    %48 = arith.extui %47 : i1 to i32
    %c0_i32_58 = arith.constant 0 : i32
    %49 = arith.cmpi ne, %48, %c0_i32_58 : i32
    scf.if %49 {
      %c0_59 = arith.constant 0 : index
      %c0_60 = arith.constant 0 : index
      %c0_61 = arith.constant 0 : index
      %c0_62 = arith.constant 0 : index
      %50 = vector.load %arg4[%c0_59, %c0_60, %c0_61, %c0_62] : memref<3x2x2x32xf32, #tpu.memory_space<vmem>>, vector<1x1x2x32xf32>
      %51 = vector.shape_cast %50 : vector<1x1x2x32xf32> to vector<2x32xf32>
      %cst_63 = arith.constant 1.250000e-01 : f32
      %52 = vector.broadcast %cst_63 : f32 to vector<2x32xf32>
      %53 = arith.mulf %51, %52 : vector<2x32xf32>
      %c0_64 = arith.constant 0 : index
      %c0_65 = arith.constant 0 : index
      %c0_66 = arith.constant 0 : index
      %c0_67 = arith.constant 0 : index
      %54 = vector.load %arg4[%c0_64, %c0_65, %c0_66, %c0_67] : memref<3x2x2x32xf32, #tpu.memory_space<vmem>>, vector<1x1x2x32xf32>
      %55 = vector.shape_cast %54 : vector<1x1x2x32xf32> to vector<2x32xf32>
      %56 = vector.shape_cast %53 : vector<2x32xf32> to vector<1x1x2x32xf32>
      tpu.vector_store %arg4[%c0_64, %c0_65, %c0_66, %c0_67], %56 {strides = array<i32>} : memref<3x2x2x32xf32, #tpu.memory_space<vmem>>, vector<1x1x2x32xf32>,
      %c0_68 = arith.constant 0 : index
      %c1_69 = arith.constant 1 : index
      %c0_70 = arith.constant 0 : index
      %c0_71 = arith.constant 0 : index
      %57 = vector.load %arg4[%c0_68, %c1_69, %c0_70, %c0_71] : memref<3x2x2x32xf32, #tpu.memory_space<vmem>>, vector<1x1x2x32xf32>
      %58 = vector.shape_cast %57 : vector<1x1x2x32xf32> to vector<2x32xf32>
      %cst_72 = arith.constant 1.250000e-01 : f32
      %59 = vector.broadcast %cst_72 : f32 to vector<2x32xf32>
      %60 = arith.mulf %58, %59 : vector<2x32xf32>
      %c0_73 = arith.constant 0 : index
      %c1_74 = arith.constant 1 : index
      %c0_75 = arith.constant 0 : index
      %c0_76 = arith.constant 0 : index
      %61 = vector.load %arg4[%c0_73, %c1_74, %c0_75, %c0_76] : memref<3x2x2x32xf32, #tpu.memory_space<vmem>>, vector<1x1x2x32xf32>
      %62 = vector.shape_cast %61 : vector<1x1x2x32xf32> to vector<2x32xf32>
      %63 = vector.shape_cast %60 : vector<2x32xf32> to vector<1x1x2x32xf32>
      tpu.vector_store %arg4[%c0_73, %c1_74, %c0_75, %c0_76], %63 {strides = array<i32>} : memref<3x2x2x32xf32, #tpu.memory_space<vmem>>, vector<1x1x2x32xf32>,
    } else {
    }
    return
  }
  func.func @transform_0(%arg0: i32, %arg1: i32) -> (i32, i32, i32) {
    %c0_i32 = arith.constant 0 : i32
    %c0_i32_0 = arith.constant 0 : i32
    return %arg0, %arg1, %c0_i32 : i32, i32, i32
  }
  func.func @transform_1(%arg0: i32, %arg1: i32) -> (i32, i32, i32) {
    %c0_i32 = arith.constant 0 : i32
    %c0_i32_0 = arith.constant 0 : i32
    return %arg0, %arg1, %c0_i32 : i32, i32, i32
  }
  func.func @transform_2(%arg0: i32, %arg1: i32) -> (i32, i32, i32, i32) {
    %c0_i32 = arith.constant 0 : i32
    %c0_i32_0 = arith.constant 0 : i32
    %c0_i32_1 = arith.constant 0 : i32
    %c0_i32_2 = arith.constant 0 : i32
    return %c0_i32, %c0_i32_0, %arg0, %c0_i32_1 : i32, i32, i32, i32
  }
}

</mosaic_0001>

<bundles_post_ra>
// kernel: deepnano_forward.2
= control target key start
LH: loop header
LB: loop body
LE: loop exit
PB: predicated region body
PF: predicated region fallthrough
CT: control target
= control target key end

     0   :  { %7 = vsyncpa [#allocation3], 0  ;;  %s434_s0 = inlined_call_operand.hbm [shape: f32[2,8,32], index: 0, kind: input, shape index: {}]   ;;  %s435_s1 = inlined_call_operand.hbm [shape: f32[2,8,32], index: 1, kind: input, shape index: {}]   ;;  %s436_s2 = inlined_call_operand.vmem [shape: f32[3,2,2,32], index: 2, kind: output, shape index: {}]  }
   0x1   :  { %8 = vsyncpa [#allocation5], 0  ;;  %s280_s9 = smov [#allocation2]   ;;  %s232_s13 = scalar_lea.hbm %s434_s0, 256 }
   0x2   :  { %s14_s10 = sshll.u32 %s280_s9, 4  ;;  %p233_p0 = scmp.ne.s32.totalorder %s434_s0, %s232_s13  ;;  %s15_s10 = int_to_ptr.vmem [resolvable:$true] %s14_s10 }
   0x3   :  { %p236_p1 = scmp.lt.u32.totalorder %s232_s13, %s434_s0 }
   0x5   :  { %p238_p2 = pnand %p236_p1, %p233_p0 }
   0x7   :  { %241 = shalt.err (!%p238_p2)
}
   0x8   :  { %s242_s18 = scalar_lea.vmem %s15_s10, 256  ;;  %p247_p4 = scmp.lt.s32.totalorder %s15_s10, %s15_s10 }
   0x9   :  { %p243_p3 = scmp.ne.s32.totalorder %s15_s10, %s242_s18  ;;  %p248_p5 = scmp.lt.s32.totalorder %s242_s18, %s242_s18 }
   0xb   :  { %p249_p6 = por %p248_p5, %p247_p4 }
   0xd   :  { %p250_p7 = pnand %p249_p6, %p243_p3 }
   0xf   :  { %253 = shalt.err (!%p250_p7)
}
  0x10   :  { %s281_s19 = smov 128   ;;  %s282_s20 = smov 8  }
  0x11   :  { %20 = dma.hbm_to_vmem [thread:$0]  %s434_s0, 256, %s15_s10, [#allocation3], %s281_s19, %s281_s19, %s282_s20  }
  0x12   :  { %s283_s23 = smov [#allocation4]   ;;  %s254_s27 = scalar_lea.hbm %s435_s1, 256 }
  0x13   :  { %s26_s24 = sshll.u32 %s283_s23, 4  ;;  %p255_p8 = scmp.ne.s32.totalorder %s435_s1, %s254_s27  ;;  %s27_s24 = int_to_ptr.vmem [resolvable:$true] %s26_s24 }
  0x14   :  { %p258_p9 = scmp.lt.u32.totalorder %s254_s27, %s435_s1 }
  0x16   :  { %p260_p10 = pnand %p258_p9, %p255_p8 }
  0x18   :  { %263 = shalt.err (!%p260_p10)
}
  0x19   :  { %s264_s4 = scalar_lea.vmem %s27_s24, 256  ;;  %p269_p12 = scmp.lt.s32.totalorder %s27_s24, %s27_s24 }
  0x1a   :  { %p265_p11 = scmp.ne.s32.totalorder %s27_s24, %s264_s4  ;;  %p270_p13 = scmp.lt.s32.totalorder %s264_s4, %s264_s4 }
  0x1c   :  { %p271_p0 = por %p270_p13, %p269_p12 }
  0x1e   :  { %p272_p1 = pnand %p271_p0, %p265_p11 }
  0x20   :  { %275 = shalt.err (!%p272_p1)
}
  0x21   :  { %32 = dma.hbm_to_vmem [thread:$0]  %s435_s1, 256, %s27_s24, [#allocation5], %s281_s19, %s281_s19, %s282_s20  }
  0x22   :  { %276 = dma.done.wait [#allocation3], 256  }
  0x23   :  { %277 = vsyncadd [#allocation3], 4294967040 }
  0x24   :  { %278 = dma.done.wait [#allocation5], 256  }
  0x25   :  { %279 = vsyncadd [#allocation5], 4294967040  ;;  %vm43_vm0 = vcmask 254976   ;;  %v284_v0 = vmov 0.0   ;;  %v285_v1 = vmov inf   ;;  %v286_v2 = vmov -inf  }
  0x26   :  { %44 = vst.msk [vmem:[%s436_s2] sm:$0x3] %vm43_vm0, %v284_v0  ;;  %208 = vst.msk [vmem:[%s436_s2 + $0x2] sm:$0x3] %vm43_vm0, %v284_v0  ;;  %vm58_vm1 = vcmask 261120   ;;  %v55_v3 = vld [vmem:[#allocation2] sm:$0xff] }
  0x27   :  { %209 = vst.msk [vmem:[%s436_s2 + $0x4] sm:$0x3] %vm43_vm0, %v285_v1  ;;  %210 = vst.msk [vmem:[%s436_s2 + $0x6] sm:$0x3] %vm43_vm0, %v285_v1  ;;  %v56_v4 = vld [vmem:[#allocation2 + $0x8] sm:$0xff]  ;;  %v350_v5 = vld [vmem:[#allocation4] sm:$0xff] }
  0x28   :  { %211 = vst.msk [vmem:[%s436_s2 + $0x8] sm:$0x3] %vm43_vm0, %v286_v2  ;;  %212 = vst.msk [vmem:[%s436_s2 + $0xa] sm:$0x3] %vm43_vm0, %v286_v2  ;;  %v59_v6 = vsel %vm58_vm1, %v55_v3, 0.0  ;;  %v66_v7 = vsel %vm58_vm1, %v56_v4, 0.0 }
  0x29   :  { %v354_v8 = vld [vmem:[#allocation4 + $0x8] sm:$0xff]  ;;  %v129_v9 = vsel %vm58_vm1, %v350_v5, 0.0  ;;  %v60_v10 = vrot.slane %v59_v6, 4  ;;  %v67_v11 = vrot.slane %v66_v7, 4  ;;  %vm75_vm2 = vcmask 1041409  }
  0x2a   :  { %v130_v12 = vrot.slane %v129_v9, 4  ;;  %v136_v13 = vsel %vm58_vm1, %v354_v8, 0.0  ;;  %v83_v15 = vsel %vm58_vm1, %v55_v3, inf  ;;  %v90_v16 = vsel %vm58_vm1, %v56_v4, inf }
  0x2b   :  { %v137_v14 = vrot.slane %v136_v13, 4  ;;  %v105_v17 = vsel %vm58_vm1, %v55_v3, -inf  ;;  %v61_v18 = vadd.f32 %v60_v10, %v59_v6  ;;  %v68_v19 = vadd.f32 %v67_v11, %v66_v7 }
  0x2c   :  { %v131_v20 = vadd.f32 %v130_v12, %v129_v9  ;;  %v84_v21 = vrot.slane %v83_v15, 4  ;;  %v91_v23 = vrot.slane %v90_v16, 4  ;;  %v106_v24 = vrot.slane %v105_v17, 4 }
  0x2d   :  { %v138_v22 = vadd.f32 %v137_v14, %v136_v13  ;;  %v112_v25 = vsel %vm58_vm1, %v56_v4, -inf  ;;  %v62_v26 = vrot.slane %v61_v18, 2  ;;  %v69_v27 = vrot.slane %v68_v19, 2  ;;  %v57_v50 = vld [vmem:[%s436_s2] sm:$0x3] }
  0x2e   :  { %v132_v28 = vrot.slane %v131_v20, 2  ;;  %v85_v29 = vmin.f32 %v83_v15, %v84_v21  ;;  %v92_v31 = vmin.f32 %v90_v16, %v91_v23  ;;  %v107_v32 = vmax.f32 %v105_v17, %v106_v24  ;;  %v217_v55 = vld [vmem:[%s436_s2 + $0x2] sm:$0x3]  ;;  %v213_v2 = vld [vmem:[%s436_s2 + $0x4] sm:$0x3] }
  0x2f   :  { %v139_v30 = vrot.slane %v138_v22, 2  ;;  %v113_v33 = vrot.slane %v112_v25, 4  ;;  %v63_v34 = vadd.f32 %v62_v26, %v61_v18  ;;  %v70_v35 = vadd.f32 %v69_v27, %v68_v19  ;;  %v215_v15 = vld [vmem:[%s436_s2 + $0x8] sm:$0x3] }
  0x30   :  { %v133_v36 = vadd.f32 %v132_v28, %v131_v20  ;;  %v86_v37 = vrot.slane %v85_v29, 2  ;;  %v93_v39 = vrot.slane %v92_v31, 2  ;;  %v108_v40 = vrot.slane %v107_v32, 2 }
  0x31   :  { %v140_v38 = vadd.f32 %v139_v30, %v138_v22  ;;  %v114_v41 = vmax.f32 %v112_v25, %v113_v33  ;;  %v64_v42 = vrot.slane %v63_v34, 1  ;;  %v71_v43 = vrot.slane %v70_v35, 1 }
  0x32   :  { %v134_v44 = vrot.slane %v133_v36, 1  ;;  %v87_v45 = vmin.f32 %v85_v29, %v86_v37  ;;  %v94_v47 = vmin.f32 %v92_v31, %v93_v39  ;;  %v109_v48 = vmax.f32 %v107_v32, %v108_v40 }
  0x33   :  { %v141_v46 = vrot.slane %v140_v38, 1  ;;  %v115_v49 = vrot.slane %v114_v41, 2  ;;  %v65_v51 = vadd.f32 %v64_v42, %v63_v34  ;;  %v72_v52 = vadd.f32 %v71_v43, %v70_v35 }
  0x34   :  { %v135_v53 = vadd.f32 %v134_v44, %v133_v36  ;;  %v88_v54 = vrot.slane %v87_v45, 1  ;;  %v95_v57 = vrot.slane %v94_v47, 1  ;;  %v110_v58 = vrot.slane %v109_v48, 1  ;;  %v219_v36 = vld [vmem:[%s436_s2 + $0x6] sm:$0x3] }
  0x35   :  { %v142_v56 = vadd.f32 %v141_v46, %v140_v38  ;;  %v116_v59 = vmax.f32 %v114_v41, %v115_v49  ;;  %v76_v60 = vsel %vm75_vm2, %v72_v52, %v65_v51  ;;  %v151_v62 = vsel %vm58_vm1, %v350_v5, inf  ;;  %v221_v44 = vld [vmem:[%s436_s2 + $0xa] sm:$0x3] }
  0x36   :  { %v89_v61 = vmin.f32 %v87_v45, %v88_v54  ;;  %v158_v63 = vsel %vm58_vm1, %v354_v8, inf  ;;  %v78_v0 = vadd.f32 %v76_v60, %v57_v50  ;;  %v96_v3 = vmin.f32 %v94_v47, %v95_v57 }
  0x37   :  { %v145_v1 = vsel %vm75_vm2, %v142_v56, %v135_v53  ;;  %v111_v4 = vmax.f32 %v109_v48, %v110_v58  ;;  %v117_v7 = vrot.slane %v116_v59, 1  ;;  %v152_v9 = vrot.slane %v151_v62, 4 }
  0x38   :  { %v147_v6 = vadd.f32 %v217_v55, %v145_v1  ;;  %v159_v10 = vrot.slane %v158_v63, 4  ;;  %80 = vst.msk [vmem:[%s436_s2] sm:$0x3] %vm43_vm0, %v78_v0  ;;  %v99_v11 = vsel %vm75_vm2, %v96_v3, %v89_v61  ;;  %v173_v12 = vsel %vm58_vm1, %v350_v5, -inf }
  0x39   :  { %v180_v13 = vsel %vm58_vm1, %v354_v8, -inf  ;;  %v101_v14 = vmin.f32 %v213_v2, %v99_v11  ;;  %v118_v16 = vmax.f32 %v116_v59, %v117_v7  ;;  %v153_v17 = vmin.f32 %v151_v62, %v152_v9 }
  0x3a   :  { %218 = vst.msk [vmem:[%s436_s2 + $0x2] sm:$0x3] %vm43_vm0, %v147_v6  ;;  %v160_v18 = vmin.f32 %v158_v63, %v159_v10  ;;  %v174_v19 = vrot.slane %v173_v12, 4  ;;  %v181_v20 = vrot.slane %v180_v13, 4 }
  0x3b   :  { %214 = vst.msk [vmem:[%s436_s2 + $0x4] sm:$0x3] %vm43_vm0, %v101_v14  ;;  %v121_v5 = vsel %vm75_vm2, %v118_v16, %v111_v4  ;;  %v154_v8 = vrot.slane %v153_v17, 2 }
  0x3c   :  { %v161_v21 = vrot.slane %v160_v18, 2  ;;  %v123_v22 = vmax.f32 %v215_v15, %v121_v5  ;;  %v175_v23 = vmax.f32 %v173_v12, %v174_v19  ;;  %v182_v24 = vmax.f32 %v180_v13, %v181_v20 }
  0x3d   :  { %v155_v25 = vmin.f32 %v153_v17, %v154_v8 }
  0x3e   :  { %v162_v26 = vmin.f32 %v160_v18, %v161_v21  ;;  %216 = vst.msk [vmem:[%s436_s2 + $0x8] sm:$0x3] %vm43_vm0, %v123_v22  ;;  %v176_v27 = vrot.slane %v175_v23, 2  ;;  %v183_v28 = vrot.slane %v182_v24, 2 }
  0x3f   :  { %v156_v29 = vrot.slane %v155_v25, 1  ;;  %v196_v31 = vld [vmem:[%s436_s2] sm:$0x3] }
  0x40   :  { %v163_v30 = vrot.slane %v162_v26, 1  ;;  %v177_v32 = vmax.f32 %v175_v23, %v176_v27  ;;  %v184_v33 = vmax.f32 %v182_v24, %v183_v28  ;;  %v197_v34 = vmul.f32 0.125, %v196_v31 }
  0x41   :  { %v223_v35 = vld [vmem:[%s436_s2 + $0x2] sm:$0x3]  ;;  %v157_v37 = vmin.f32 %v155_v25, %v156_v29 }
  0x42   :  { %v164_v38 = vmin.f32 %v162_v26, %v163_v30  ;;  %v200_v39 = vmul.f32 0.125, %v223_v35  ;;  %v178_v40 = vrot.slane %v177_v32, 1  ;;  %v185_v41 = vrot.slane %v184_v33, 1  ;;  %198 = vst.msk [vmem:[%s436_s2] sm:$0x3] %vm43_vm0, %v197_v34 }
  0x44   :  { %v167_v42 = vsel %vm75_vm2, %v164_v38, %v157_v37  ;;  %224 = vst.msk [vmem:[%s436_s2 + $0x2] sm:$0x3] %vm43_vm0, %v200_v39  ;;  %v179_v45 = vmax.f32 %v177_v32, %v178_v40  ;;  %v186_v46 = vmax.f32 %v184_v33, %v185_v41 }
  0x45   :  { %v169_v43 = vmin.f32 %v219_v36, %v167_v42 }
  0x46   :  { %v189_v47 = vsel %vm75_vm2, %v186_v46, %v179_v45 }
  0x47   :  { %220 = vst.msk [vmem:[%s436_s2 + $0x6] sm:$0x3] %vm43_vm0, %v169_v43  ;;  %v191_v48 = vmax.f32 %v221_v44, %v189_v47 }
  0x49   :  { %222 = vst.msk [vmem:[%s436_s2 + $0xa] sm:$0x3] %vm43_vm0, %v191_v48 }
  0x4a   :  { %206 = vsyncpa [#allocation3], 1 }
  0x4b   :  { %207 = vsyncpa [#allocation5], 1 }

// kernel: deepnano_forward.3
= control target key start
LH: loop header
LB: loop body
LE: loop exit
PB: predicated region body
PF: predicated region fallthrough
CT: control target
= control target key end

     0   :  { %s3739_s0 = inlined_call_operand.vmem [shape: f32[3,2,2,32], index: 0, kind: input, shape index: {}]   ;;  %s3740_s1 = inlined_call_operand.hbm [shape: bf16[3,32,1024], index: 1, kind: input, shape index: {}]   ;;  %s3741_s2 = inlined_call_operand.hbm [shape: bf16[3,32,1024], index: 2, kind: input, shape index: {}]   ;;  %s3742_s3 = inlined_call_operand.hbm [shape: f32[3,1,1024], index: 3, kind: input, shape index: {}]   ;;  %s3743_s4 = inlined_call_operand.hbm [shape: bf16[3,1024,256], index: 4, kind: input, shape index: {}]   ;;  %s3744_s5 = inlined_call_operand.hbm [shape: f32[3,1,256], index: 5, kind: input, shape index: {}]   ;;  %s3745_s6 = inlined_call_operand.hbm [shape: f32[3,1,256], index: 6, kind: input, shape index: {}]   ;;  %s3746_s7 = inlined_call_operand.vmem [shape: f32[3,1,1], index: 7, kind: input, shape index: {}]   ;;  %s3747_s8 = inlined_call_operand.vmem [shape: f32[3,2,1], index: 8, kind: output, shape index: {}]  }
   0x1   :  { %3759 = sst [smem:[#allocation19_spill]] %s3739_s0 }
   0x2   :  { %3760 = sst [smem:[#allocation20_spill]] %s3740_s1 }
   0x3   :  { %3761 = sst [smem:[#allocation21_spill]] %s3741_s2 }
   0x4   :  { %3762 = sst [smem:[#allocation22_spill]] %s3743_s4 }
   0x5   :  { %3763 = sst [smem:[#allocation23_spill]] %s3746_s7 }
   0x6   :  { %3764 = sst [smem:[#allocation24_spill]] %s3747_s8 }
   0x7   :  { %13 = vsyncpa [#allocation3], 0 }
   0x8   :  { %15 = vsyncpa [#allocation3 + $0x1], 0 }
   0x9   :  { %16 = vsyncpa [#allocation5], 0 }
   0xa   :  { %18 = vsyncpa [#allocation5 + $0x1], 0 }
   0xb   :  { %19 = vsyncpa [#allocation8], 0 }
   0xc   :  { %21 = vsyncpa [#allocation8 + $0x1], 0 }
   0xd   :  { %22 = vsyncpa [#allocation11], 0 }
   0xe   :  { %24 = vsyncpa [#allocation11 + $0x1], 0  ;;  %s3182_s27 = smov 0   ;;  %s3184_s28 = smov 0  }
   0xf   :  { %s3186_s29 = smov 0   ;;  %s3188_s30 = smov 0  }
  0x10   :  { %s3190_s9 = smov 0   ;;  %s3192_s10 = smov 0  }
  0x11 LB: > { %3765 = sst [smem:[#allocation16_spill]] %s3112_s29  ;;  %s3748_s11 = sadd.s32 4294967295, %s3124_s10   ;;  %s3124_s10 = sphi %s3192_s10, %s30_s10   ;;  %s3120_s9 = sphi %s3190_s9, %s3796_s9   ;;  %s3116_s30 = sphi %s3188_s30, %s3795_s30   ;;  %s3112_s29 = sphi %s3186_s29, %s3791_s29   ;;  %s3108_s28 = sphi %s3184_s28, %s3794_s28   ;;  %s3104_s27 = sphi %s3182_s27, %s3793_s27  }
  0x12   : > { %s42_s12 = sadd.s32 1, %s3120_s9  ;;  %s77_s13 = sadd.s32 1, %s3112_s29 }
  0x13   : > { %p44_p0 = scmp.ge.s32.totalorder %s42_s12, 3  ;;  %p84_p1 = scmp.ne.s32.totalorder %s3112_s29, %s3108_s28 }
  0x14   : > { %p85_p2 = scmp.eq.s32.totalorder %s3124_s10, 0  ;;  %p90_p4 = scmp.ne.s32.totalorder %s3108_s28, %s3104_s27 }
  0x15   : > { %s3798_s12 = smov (%p44_p0, %s42_s12), 0  ;;  %p91_p5 = scmp.eq.s32.totalorder %s3748_s11, 0 }
  0x16   : > { %3766 = sst [smem:[#allocation17_spill]] %s3798_s12  ;;  %p86_p3 = por %p85_p2, %p84_p1 }
  0x17   : > { %s74_s14 = ssub.s32 %s3120_s9, %s3798_s12  ;;  %p3223_p7 = por %p91_p5, %p90_p4 }
  0x18   : > { %p75_p6 = scmp.eq.s32.totalorder %s74_s14, 0  ;;  %p2632_p8 = scmp.lt.s32.totalorder %s3124_s10, 3 }
  0x19   : > { %s3767_s15 = scalar_select %p3223_p7, 1, 0 }
  0x1a   : > { %s3229_s16 = scalar_select %p75_p6, %s3112_s29, %s77_s13  }
  0x1b   : > { %s3232_s17 = sand.u32 1, %s3112_s29   ;;  %s3750_s18 = sshll.u32 %s3120_s9, 11 }
  0x1c   : > { %3768 = sst [smem:[#allocation18_spill]] %s3229_s16  ;;  %s3749_s19 = sshll.u32 %s3232_s17, 7 }
  0x1d   : > { %p3236_p9 = pnand %p2632_p8, %p86_p3  ;;  %s3752_s21 = sand.u32 1, %s3124_s10  }
  0x1e   : > { %s3770_s2 = sld [smem:[#allocation21_spill]]  ;;  %s334_s25 = scalar_lea.vmem [#allocation4], %s3749_s19 }
  0x1f   : > { %s3769_s20 = scalar_select %p3236_p9, 1, 0 }
  0x20   : > { %s341_s26 = sshll.u32 %s334_s25, 4  ;;  %s3255_s27 = scalar_lea.sflag [#allocation5], %s3752_s21  ;;  %s3250_s26 = int_to_ptr.vmem [resolvable:$true] %s341_s26 }
  0x21   : > { %p3261_p12 = pneg %p3236_p9 }
  0x24   : > { %s3246_s24 = scalar_lea.hbm %s3770_s2, %s3750_s18  ;;  %s2887_s25 = scalar_lea.hbm %s3770_s2, 6144 }
  0x25   : > { %s2882_s13 = scalar_lea.hbm %s3246_s24, 2048  ;;  %p2888_p1 = scmp.lt.u32.totalorder %s3246_s24, %s3770_s2 }
  0x26   : > { %p2883_p11 = scmp.ne.s32.totalorder %s3246_s24, %s2882_s13  ;;  %p2889_p2 = scmp.lt.u32.totalorder %s2887_s25, %s2882_s13 }
  0x27   : > { %p2891_p4 = scmp.lt.u32.totalorder %s2882_s13, %s3246_s24 }
  0x28   : > { %p2885_p13 = pnand %p3261_p12, %p2883_p11  ;;  %p2890_p3 = por %p2889_p2, %p2888_p1 }
  0x2a   : > { %p2886_p0 = pneg %p2885_p13  ;;  %p2892_p5 = por %p2891_p4, %p2890_p3 }
  0x2c   : > { %p2893_p6 = pnand %p2892_p5, %p2886_p0 }
  0x2e   : > { %2896 = shalt.err (!%p2893_p6)
}
  0x2f   : > { %s2897_s18 = scalar_lea.vmem %s3250_s26, 2048  ;;  %s3126_s22 = smov [#allocation4]  }
  0x30   : > { %p2898_p8 = scmp.ne.s32.totalorder %s3250_s26, %s2897_s18  ;;  %s2902_s23 = sshll.u32 %s3126_s22, 4  ;;  %s2903_s23 = int_to_ptr.vmem [resolvable:$false] %s2902_s23 }
  0x31   : > { %s2904_s11 = scalar_lea.vmem %s2903_s23, 4096  ;;  %p2905_p10 = scmp.lt.s32.totalorder %s3250_s26, %s2903_s23 }
  0x32   : > { %p2900_p11 = pnand %p2898_p8, %p3261_p12  ;;  %p2906_p7 = scmp.lt.s32.totalorder %s2904_s11, %s2897_s18 }
  0x34   : > { %p2901_p13 = pneg %p2900_p11  ;;  %p2907_p1 = por %p2906_p7, %p2905_p10 }
  0x36   : > { %p2908_p2 = pnand %p2907_p1, %p2901_p13 }
  0x38   : > { %2911 = shalt.err (!%p2908_p2)
}
  0x39   : > { %s3754_s19 = smov 512   ;;  %s3755_s13 = smov 32  }
  0x3a   : > { %2619 = dma.hbm_to_vmem [thread:$0]  (!%p3236_p9), %s3246_s24, 2048, %s3250_s26, %s3255_s27, %s3754_s19, %s3754_s19, %s3755_s13  }
  0x3b   : > { %p433_p7 = scmp.lt.s32.totalorder %s3124_s10, 4  ;;  %s2390_s18 = sshll.u32 %s3232_s17, 10 }
  0x3c   : > { %s2585_s25 = sshll.u32 %s3120_s9, 14  ;;  %p3772_p10 = scmp.ge.s32.totalorder %s3124_s10, 1 }
  0x3d   : > { %s3774_s4 = sld [smem:[#allocation22_spill]]  ;;  %s374_s2 = scalar_lea.vmem [#allocation7], %s2390_s18 }
  0x3e   : > { %p3293_p0 = pnand %p3772_p10, %p433_p7  ;;  %s381_s12 = sshll.u32 %s374_s2, 4  ;;  %s3302_s12 = int_to_ptr.vmem [resolvable:$true] %s381_s12 }
  0x3f   : > { %s3775_s24 = sand.u32 1, %s3124_s10  }
  0x40   : > { %s3773_s22 = scalar_select %p3293_p0, 1, 0 }
  0x41   : > { %s3306_s26 = scalar_lea.sflag [#allocation8], %s3775_s24 }
  0x43   : > { %s3300_s21 = scalar_lea.hbm %s3774_s4, %s2585_s25  ;;  %s2917_s25 = scalar_lea.hbm %s3774_s4, 49152 }
  0x44   : > { %s2912_s19 = scalar_lea.hbm %s3300_s21, 16384  ;;  %p2918_p6 = scmp.lt.u32.totalorder %s3300_s21, %s3774_s4 }
  0x45   : > { %p2913_p3 = scmp.ne.s32.totalorder %s3300_s21, %s2912_s19  ;;  %p2919_p8 = scmp.lt.u32.totalorder %s2917_s25, %s2912_s19 }
  0x46   : > { %p2921_p13 = scmp.lt.u32.totalorder %s2912_s19, %s3300_s21 }
  0x47   : > { %p2915_p4 = pnand %p2913_p3, %p3261_p12  ;;  %p2920_p11 = por %p2919_p8, %p2918_p6 }
  0x49   : > { %p2916_p5 = pneg %p2915_p4  ;;  %p2922_p1 = por %p2921_p13, %p2920_p11 }
  0x4b   : > { %p2923_p2 = pnand %p2922_p1, %p2916_p5 }
  0x4d   : > { %2926 = shalt.err (!%p2923_p2)
}
  0x4e   : > { %s2927_s2 = scalar_lea.vmem %s3302_s12, 16384  ;;  %s3129_s13 = smov [#allocation7]  }
  0x4f   : > { %p2928_p7 = scmp.ne.s32.totalorder %s3302_s12, %s2927_s2  ;;  %s2932_s18 = sshll.u32 %s3129_s13, 4  ;;  %s2933_s18 = int_to_ptr.vmem [resolvable:$false] %s2932_s18 }
  0x50   : > { %s2934_s16 = scalar_lea.vmem %s2933_s18, 32768  ;;  %p2935_p4 = scmp.lt.s32.totalorder %s3302_s12, %s2933_s18 }
  0x51   : > { %p2930_p10 = pnand %p2928_p7, %p3261_p12  ;;  %p2936_p0 = scmp.lt.s32.totalorder %s2934_s16, %s2927_s2 }
  0x53   : > { %p2931_p3 = pneg %p2930_p10  ;;  %p2937_p6 = por %p2936_p0, %p2935_p4 }
  0x55   : > { %p2938_p8 = pnand %p2937_p6, %p2931_p3 }
  0x57   : > { %2941 = shalt.err (!%p2938_p8)
}
  0x58   : > { %s3130_s19 = smov 128   ;;  %s3131_s24 = smov 8  }
  0x59   : > { %2625 = dma.hbm_to_vmem [thread:$0]  (!%p3236_p9), %s3300_s21, 16384, %s3302_s12, %s3306_s26, %s3130_s19, %s3130_s19, %s3131_s24  }
  0x5a   : > { %s3776_s23 = sshll.u32 %s3120_s9, 11  ;;  %s3777_s1 = sld [smem:[#allocation20_spill]] }
  0x5b   : > { %s3778_s13 = sshll.u32 %s3232_s17, 7  ;;  %s2387_s4 = sshll.u32 %s3232_s17, 3 }
  0x5c   : > { %s313_s18 = scalar_lea.vmem [#allocation2], %s3778_s13  ;;  %s310_s29 = scalar_lea.sflag [#allocation3], %s3232_s17 }
  0x5d   : > { %s320_s16 = sshll.u32 %s313_s18, 4  ;;  %s3340_s16 = int_to_ptr.vmem [resolvable:$true] %s320_s16 }
  0x60   : > { %s3335_s2 = scalar_lea.hbm %s3777_s1, %s3776_s23  ;;  %s2947_s19 = scalar_lea.hbm %s3777_s1, 6144 }
  0x61   : > { %s2942_s8 = scalar_lea.hbm %s3335_s2, 2048  ;;  %p2948_p13 = scmp.lt.u32.totalorder %s3335_s2, %s3777_s1 }
  0x62   : > { %p2943_p0 = scmp.ne.s32.totalorder %s3335_s2, %s2942_s8  ;;  %p2949_p1 = scmp.lt.u32.totalorder %s2947_s19, %s2942_s8 }
  0x63   : > { %p2951_p7 = scmp.lt.u32.totalorder %s2942_s8, %s3335_s2 }
  0x64   : > { %p2945_p5 = pnand %p2943_p0, %p3261_p12  ;;  %p2950_p2 = por %p2949_p1, %p2948_p13 }
  0x66   : > { %p2946_p11 = pneg %p2945_p5  ;;  %p2952_p10 = por %p2951_p7, %p2950_p2 }
  0x68   : > { %p2953_p3 = pnand %p2952_p10, %p2946_p11 }
  0x6a   : > { %2956 = shalt.err (!%p2953_p3)
}
  0x6b   : > { %s2957_s25 = scalar_lea.vmem %s3340_s16, 2048  ;;  %s3132_s11 = smov [#allocation2]  }
  0x6c   : > { %p2958_p4 = scmp.ne.s32.totalorder %s3340_s16, %s2957_s25  ;;  %s2962_s13 = sshll.u32 %s3132_s11, 4  ;;  %s2963_s13 = int_to_ptr.vmem [resolvable:$false] %s2962_s13 }
  0x6d   : > { %s2964_s18 = scalar_lea.vmem %s2963_s13, 4096  ;;  %p2965_p0 = scmp.lt.s32.totalorder %s3340_s16, %s2963_s13 }
  0x6e   : > { %p2960_p6 = pnand %p2958_p4, %p3261_p12  ;;  %p2966_p5 = scmp.lt.s32.totalorder %s2964_s18, %s2957_s25 }
  0x70   : > { %p2961_p8 = pneg %p2960_p6  ;;  %p2967_p13 = por %p2966_p5, %p2965_p0 }
  0x72   : > { %p2968_p1 = pnand %p2967_p13, %p2961_p8 }
  0x74   : > { %2971 = shalt.err (!%p2968_p1)
}
  0x75   : > { %s3779_s8 = smov 32   ;;  %s3780_s12 = smov 512  }
  0x76   : > { %2616 = dma.hbm_to_vmem [thread:$0]  (!%p3236_p9), %s3335_s2, 2048, %s3340_s16, %s310_s29, %s3780_s12, %s3780_s12, %s3779_s8  }
  0x77   : > { %s2584_s21 = sshll.u32 %s3120_s9, 7  ;;  %s355_s19 = scalar_lea.vmem [#allocation6], %s2387_s4 }
  0x78   : > { %s363_s24 = sshll.u32 %s355_s19, 4  ;;  %s361_s11 = scalar_lea.hbm %s3742_s3, %s2584_s21  ;;  %s364_s24 = int_to_ptr.vmem [resolvable:$true] %s363_s24 }
  0x79   : > { %s2972_s13 = scalar_lea.hbm %s361_s11, 128  ;;  %s2977_s7 = scalar_lea.hbm %s3742_s3, 384 }
  0x7a   : > { %p2973_p11 = scmp.ne.s32.totalorder %s361_s11, %s2972_s13  ;;  %p2978_p10 = scmp.lt.u32.totalorder %s361_s11, %s3742_s3 }
  0x7b   : > { %p2979_p3 = scmp.lt.u32.totalorder %s2977_s7, %s2972_s13  ;;  %p2981_p6 = scmp.lt.u32.totalorder %s2972_s13, %s361_s11 }
  0x7c   : > { %p2975_p2 = pnand %p2973_p11, %p3261_p12 }
  0x7d   : > { %p2980_p4 = por %p2979_p3, %p2978_p10 }
  0x7e   : > { %p2976_p7 = pneg %p2975_p2 }
  0x7f   : > { %p2982_p8 = por %p2981_p6, %p2980_p4 }
  0x81   : > { %p2983_p0 = pnand %p2982_p8, %p2976_p7 }
  0x83   : > { %2986 = shalt.err (!%p2983_p0)
}
  0x84   : > { %s2987_s4 = scalar_lea.vmem %s364_s24, 128  ;;  %s3133_s2 = smov [#allocation6]  }
  0x85   : > { %p2988_p5 = scmp.ne.s32.totalorder %s364_s24, %s2987_s4  ;;  %s2992_s16 = sshll.u32 %s3133_s2, 4  ;;  %s2993_s16 = int_to_ptr.vmem [resolvable:$false] %s2992_s16 }
  0x86   : > { %s2994_s1 = scalar_lea.vmem %s2993_s16, 256  ;;  %p2995_p11 = scmp.lt.s32.totalorder %s364_s24, %s2993_s16 }
  0x87   : > { %p2990_p13 = pnand %p2988_p5, %p3261_p12  ;;  %p2996_p2 = scmp.lt.s32.totalorder %s2994_s1, %s2987_s4 }
  0x89   : > { %p2991_p1 = pneg %p2990_p13  ;;  %p2997_p9 = por %p2996_p2, %p2995_p11 }
  0x8b   : > { %p2998_p3 = pnand %p2997_p9, %p2991_p1 }
  0x8d   : > { %3001 = shalt.err (!%p2998_p3)
}
  0x8e   : > { %p3781_p10 = scmp.ne.s32.totalorder %s3769_s20, 0  ;;  %s2393_s0 = sshll.u32 %s3232_s17, 1 }
  0x8f   : > { %s2586_s7 = sshll.u32 %s3120_s9, 5  ;;  %s395_s19 = scalar_lea.vmem [#allocation9], %s2393_s0 }
  0x90   : > { %2622 = dma.hbm_to_vmem [thread:$0]  (!%p3781_p10), %s361_s11, 128, %s364_s24, %s3255_s27  }
  0x91   : > { %s3395_s21 = scalar_lea.hbm %s3744_s5, %s2586_s7  ;;  %s403_s23 = sshll.u32 %s395_s19, 4  ;;  %s404_s23 = int_to_ptr.vmem [resolvable:$true] %s403_s23 }
  0x92   : > { %s3002_s25 = scalar_lea.hbm %s3395_s21, 32  ;;  %s3007_s11 = scalar_lea.hbm %s3744_s5, 96 }
  0x93   : > { %p3003_p9 = scmp.ne.s32.totalorder %s3395_s21, %s3002_s25  ;;  %p3008_p6 = scmp.lt.u32.totalorder %s3395_s21, %s3744_s5 }
  0x94   : > { %p3009_p8 = scmp.lt.u32.totalorder %s3007_s11, %s3002_s25  ;;  %p3011_p5 = scmp.lt.u32.totalorder %s3002_s25, %s3395_s21 }
  0x95   : > { %p3005_p7 = pnand %p3003_p9, %p3261_p12 }
  0x96   : > { %p3010_p0 = por %p3009_p8, %p3008_p6 }
  0x97   : > { %p3006_p4 = pneg %p3005_p7 }
  0x98   : > { %p3012_p13 = por %p3011_p5, %p3010_p0 }
  0x9a   : > { %p3013_p1 = pnand %p3012_p13, %p3006_p4 }
  0x9c   : > { %3016 = shalt.err (!%p3013_p1)
}
  0x9d   : > { %s3017_s29 = scalar_lea.vmem %s404_s23, 32  ;;  %s3134_s4 = smov [#allocation9]  }
  0x9e   : > { %p3018_p11 = scmp.ne.s32.totalorder %s404_s23, %s3017_s29  ;;  %s3022_s2 = sshll.u32 %s3134_s4, 4  ;;  %s3023_s2 = int_to_ptr.vmem [resolvable:$false] %s3022_s2 }
  0x9f   : > { %s3024_s16 = scalar_lea.vmem %s3023_s2, 64  ;;  %p3025_p9 = scmp.lt.s32.totalorder %s404_s23, %s3023_s2 }
  0xa0   : > { %p3020_p2 = pnand %p3018_p11, %p3261_p12  ;;  %p3026_p7 = scmp.lt.s32.totalorder %s3024_s16, %s3017_s29 }
  0xa2   : > { %p3021_p3 = pneg %p3020_p2  ;;  %p3027_p10 = por %p3026_p7, %p3025_p9 }
  0xa4   : > { %p3028_p6 = pnand %p3027_p10, %p3021_p3 }
  0xa6   : > { %3031 = shalt.err (!%p3028_p6)
}
  0xa7   : > { %p3782_p8 = scmp.ne.s32.totalorder %s3769_s20, 0  ;;  %s3422_s12 = scalar_lea.hbm %s3745_s6, %s2586_s7 }
  0xa8   : > { %s414_s19 = scalar_lea.vmem [#allocation10], %s2393_s0  ;;  %s411_s27 = scalar_lea.sflag [#allocation11], %s3232_s17 }
  0xa9   : > { %2628 = dma.hbm_to_vmem [thread:$0]  (!%p3782_p8), %s3395_s21, 32, %s404_s23, %s3306_s26  }
  0xaa   : > { %s422_s25 = sshll.u32 %s414_s19, 4  ;;  %s3032_s24 = scalar_lea.hbm %s3422_s12, 32  ;;  %s423_s25 = int_to_ptr.vmem [resolvable:$true] %s422_s25 }
  0xab   : > { %p3033_p10 = scmp.ne.s32.totalorder %s3422_s12, %s3032_s24  ;;  %s3037_s23 = scalar_lea.hbm %s3745_s6, 96 }
  0xac   : > { %p3038_p5 = scmp.lt.u32.totalorder %s3422_s12, %s3745_s6  ;;  %p3039_p13 = scmp.lt.u32.totalorder %s3037_s23, %s3032_s24 }
  0xad   : > { %p3035_p4 = pnand %p3033_p10, %p3261_p12  ;;  %p3041_p11 = scmp.lt.u32.totalorder %s3032_s24, %s3422_s12 }
  0xae   : > { %p3040_p1 = por %p3039_p13, %p3038_p5 }
  0xaf   : > { %p3036_p0 = pneg %p3035_p4 }
  0xb0   : > { %p3042_p2 = por %p3041_p11, %p3040_p1 }
  0xb2   : > { %p3043_p3 = pnand %p3042_p2, %p3036_p0 }
  0xb4   : > { %3046 = shalt.err (!%p3043_p3)
}
  0xb5   : > { %s3047_s17 = scalar_lea.vmem %s423_s25, 32  ;;  %s3135_s0 = smov [#allocation10]  }
  0xb6   : > { %p3048_p9 = scmp.ne.s32.totalorder %s423_s25, %s3047_s17  ;;  %s3052_s13 = sshll.u32 %s3135_s0, 4  ;;  %s3053_s13 = int_to_ptr.vmem [resolvable:$false] %s3052_s13 }
  0xb7   : > { %s3054_s18 = scalar_lea.vmem %s3053_s13, 64  ;;  %p3055_p10 = scmp.lt.s32.totalorder %s423_s25, %s3053_s13 }
  0xb8   : > { %p3050_p7 = pnand %p3048_p9, %p3261_p12  ;;  %p3056_p4 = scmp.lt.s32.totalorder %s3054_s18, %s3047_s17 }
  0xba   : > { %p3051_p6 = pneg %p3050_p7  ;;  %p3057_p8 = por %p3056_p4, %p3055_p10 }
  0xbc   : > { %p3058_p5 = pnand %p3057_p8, %p3051_p6 }
  0xbe   : > { %3061 = shalt.err (!%p3058_p5)
}
  0xbf   : > { %p3783_p13 = scmp.ne.s32.totalorder %s3769_s20, 0  ;;  %p3784_p0 = scmp.ne.s32.totalorder %s3773_s22, 0 }
  0xc0   : > { %s439_s14 = sand.u32 (!%p3784_p0), 1, %s3108_s28   ;;  %p3785_p12 = scmp.ne.s32.totalorder (!%p3784_p0), %s3767_s15, 0 }
  0xc1   : > { %2631 = dma.hbm_to_vmem [thread:$0]  (!%p3783_p13), %s3422_s12, 32, %s423_s25, %s411_s27  }
  0xc2   : > { %437 = sbr.rel (%p3784_p0) target bundleno = 928 (0x3a0), region = 52  ;;  %s2400_s29 = sshll.u32 (!%p3784_p0), %s439_s14, 7 }
  0xc3   : > { %s440_s4 = scalar_lea.sflag (!%p3784_p0), [#allocation3], %s439_s14  ;;  %s3447_s2 = scalar_lea.vmem (!%p3784_p0), [#allocation2], %s2400_s29 }
  0xc9   : > { %3087 = dma.done.wait (%p3785_p12), %s440_s4, 2048  }
  0xca   : > { %3089 = vsyncadd (%p3785_p12), %s440_s4, 4294965248  ;;  %s3786_s16 = sadd.s32 4294967295, %s3124_s10   ;;  %s3455_s8 = scalar_lea.vmem [#allocation4], %s2400_s29 }
  0xcb   : > { %s448_s20 = sand.u32 1, %s3786_s16  }
  0xcc   : > { %s449_s1 = scalar_lea.sflag [#allocation5], %s448_s20 }
  0xcd   : > { %3091 = dma.done.wait (%p3785_p12), %s449_s1, 2176  }
  0xce   : > { %3093 = vsyncadd (%p3785_p12), %s449_s1, 4294965120  ;;  %s2402_s22 = sshll.u32 %s439_s14, 3  ;;  %s2403_s12 = sshll.u32 %s439_s14, 10 }
  0xcf   : > { %s3461_s19 = scalar_lea.vmem [#allocation6], %s2402_s22  ;;  %s467_s25 = scalar_lea.sflag [#allocation8], %s448_s20 }
  0xd0   : > { %s3463_s27 = scalar_lea.vmem [#allocation7], %s2403_s12 }
  0xd1   : > { %3095 = dma.done.wait (%p3785_p12), %s467_s25, 16416  }
  0xd2   : > { %3097 = vsyncadd (%p3785_p12), %s467_s25, 4294950880  ;;  %s2404_s24 = sshll.u32 %s439_s14, 1  ;;  %s485_s21 = scalar_lea.sflag [#allocation11], %s439_s14 }
  0xd3   : > { %s3469_s26 = scalar_lea.vmem [#allocation9], %s2404_s24  ;;  %s3471_s23 = scalar_lea.vmem [#allocation10], %s2404_s24 }
  0xd4   : > { %3099 = dma.done.wait (%p3785_p12), %s485_s21, 32  }
  0xd5   : > { %3101 = vsyncadd (%p3785_p12), %s485_s21, 4294967264  ;;  %p559_p8 = scmp.lt.s32.totalorder %s3116_s30, 2  ;;  %v3136_v0 = vmov 0   ;;  %v599_v1 = vld [vmem:[%s3455_s8] sm:$0xff]  ;;  %s3787_s17 = sld [smem:[#allocation19_spill]]  ;;  %v601_v8 = vld [vmem:[%s3455_s8 + $0x10] sm:$0xff] }
  0xd6   : > { %731 = vmatprep.mubr.bf16.mxu0 %v3136_v0  ;;  %772 = vmatprep.mubr.bf16.mxu1 %v3136_v0  ;;  %v603_v2 = vld [vmem:[%s3455_s8 + $0x20] sm:$0xff]  ;;  %v605_v9 = vld [vmem:[%s3455_s8 + $0x30] sm:$0xff]  ;;  %v600_v15 = vld [vmem:[%s3455_s8 + $0x8] sm:$0xff]  ;;  %vm695_vm0 = vcmask 261120   ;;  %vm2136_vm1 = vcmask 1041408   ;;  %s3788_s14 = sld [smem:[#allocation23_spill]] }
  0xd7   : > { %s3800_s30 = smov (!%p559_p8, %s3116_s30), 2  ;;  %v607_v3 = vld [vmem:[%s3455_s8 + $0x40] sm:$0xff]  ;;  %v2411_v4 = vcombine.high %v599_v1, %v603_v2  ;;  %v2410_v5 = vcombine.low %v599_v1, %v603_v2  ;;  %v2415_v12 = vcombine.high %v601_v8, %v605_v9  ;;  %v609_v13 = vld [vmem:[%s3455_s8 + $0x50] sm:$0xff]  ;;  %v604_v16 = vld [vmem:[%s3455_s8 + $0x28] sm:$0xff]  ;;  %v2414_v22 = vcombine.low %v601_v8, %v605_v9  ;;  %s3789_s20 = sld [smem:[#allocation24_spill]] }
  0xd8   : > { %s2588_s7 = sshll.u32 %s3800_s30, 2  ;;  %v611_v6 = vld [vmem:[%s3455_s8 + $0x60] sm:$0xff]  ;;  %v613_v14 = vld [vmem:[%s3455_s8 + $0x70] sm:$0xff]  ;;  %v608_v17 = vld [vmem:[%s3455_s8 + $0x48] sm:$0xff]  ;;  %v2413_v19 = vcombine.high %v600_v15, %v604_v16  ;;  %v2412_v20 = vcombine.low %v600_v15, %v604_v16  ;;  %s2408_s4 = sshll.u32 %s3800_s30, 1  ;;  %vm2156_vm2 = vcmask 1024  }
  0xd9   : > { %v2419_v7 = vcombine.high %v607_v3, %v611_v6  ;;  %699 = vmatprep.subr.bf16.mxu0 %v2411_v4  ;;  %v2418_v10 = vcombine.low %v607_v3, %v611_v6  ;;  %v612_v21 = vld [vmem:[%s3455_s8 + $0x68] sm:$0xff]  ;;  %v602_v24 = vld [vmem:[%s3455_s8 + $0x18] sm:$0xff]  ;;  %v2423_v26 = vcombine.high %v609_v13, %v613_v14  ;;  %v583_v27 = vld [vmem:[%s3447_s2] sm:$0xff]  ;;  %v2422_v31 = vcombine.low %v609_v13, %v613_v14 }
  0xda   : > { %700 = vmatpush1.bf16.msra.mxu0 %v2410_v5  ;;  %v2421_v23 = vcombine.high %v608_v17, %v612_v21  ;;  %v606_v25 = vld [vmem:[%s3455_s8 + $0x38] sm:$0xff]  ;;  %740 = vmatprep.subr.bf16.mxu1 %v2413_v19  ;;  %v587_v28 = vld [vmem:[%s3447_s2 + $0x20] sm:$0xff]  ;;  %v2420_v29 = vcombine.low %v608_v17, %v612_v21  ;;  %v584_v40 = vld [vmem:[%s3447_s2 + $0x8] sm:$0xff] }
  0xdb   : > { %s3491_s0 = scalar_lea.vmem %s3787_s17, %s2588_s7  ;;  %701 = vmatprep.subr.bf16.mxu0 %v2419_v7  ;;  %741 = vmatpush1.bf16.msra.mxu1 %v2412_v20  ;;  %v2417_v30 = vcombine.high %v602_v24, %v606_v25  ;;  %v610_v32 = vld [vmem:[%s3455_s8 + $0x58] sm:$0xff]  ;;  %v2431_v34 = vcombine.high %v583_v27, %v587_v28  ;;  %v591_v35 = vld [vmem:[%s3447_s2 + $0x40] sm:$0xff]  ;;  %v2416_v37 = vcombine.low %v602_v24, %v606_v25  ;;  %v588_v41 = vld [vmem:[%s3447_s2 + $0x28] sm:$0xff] }
  0xdc   : > { %v2409_v11 = vld [vmem:[%s3491_s0 + $0x2] sm:$0x3]  ;;  %742 = vmatprep.subr.bf16.mxu1 %v2421_v23  ;;  %v614_v33 = vld [vmem:[%s3455_s8 + $0x78] sm:$0xff]  ;;  %v2430_v39 = vcombine.low %v583_v27, %v587_v28  ;;  %v585_v43 = vld [vmem:[%s3447_s2 + $0x10] sm:$0xff]  ;;  %v2433_v47 = vcombine.high %v584_v40, %v588_v41  ;;  %v2432_v54 = vcombine.low %v584_v40, %v588_v41  ;;  %s569_s29 = scalar_lea.vmem %s3788_s14, %s3800_s30 }
  0xdd   : > { %v3501_v18 = vpack.c.bf16 %v2409_v11, %v2409_v11  ;;  %v595_v36 = vld [vmem:[%s3447_s2 + $0x60] sm:$0xff]  ;;  %v2425_v38 = vcombine.high %v610_v32, %v614_v33  ;;  %v589_v44 = vld [vmem:[%s3447_s2 + $0x30] sm:$0xff]  ;;  %v2424_v45 = vcombine.low %v610_v32, %v614_v33  ;;  %v592_v49 = vld [vmem:[%s3447_s2 + $0x48] sm:$0xff]  ;;  %s576_s1 = scalar_lea.vmem %s3789_s20, %s2408_s4 }
  0xde   : > { %702 = vmatpush1.bf16.msra.mxu0 %v2418_v10  ;;  %v2439_v42 = vcombine.high %v591_v35, %v595_v36  ;;  %v578_v46 = vld [vmem:[%s3491_s0] sm:$0x3]  ;;  %v2438_v48 = vcombine.low %v591_v35, %v595_v36  ;;  %v596_v50 = vld [vmem:[%s3447_s2 + $0x68] sm:$0xff]  ;;  %v2435_v51 = vcombine.high %v585_v43, %v589_v44  ;;  %v593_v52 = vld [vmem:[%s3447_s2 + $0x50] sm:$0xff]  ;;  %v2434_v57 = vcombine.low %v585_v43, %v589_v44 }
  0xdf   : > { %781 = vmatprep.subr.bf16.mxu0 %v2415_v12  ;;  %743 = vmatpush1.bf16.msra.mxu1 %v2420_v29  ;;  %v597_v53 = vld [vmem:[%s3447_s2 + $0x70] sm:$0xff]  ;;  %v579_v55 = vpack.c.bf16 %v578_v46, %v578_v46  ;;  %v2441_v56 = vcombine.high %v592_v49, %v596_v50  ;;  %v586_v58 = vld [vmem:[%s3447_s2 + $0x18] sm:$0xff]  ;;  %v2440_v61 = vcombine.low %v592_v49, %v596_v50  ;;  %v2703_v8 = vld [vmem:[%s3463_s27 + $0x214] ss:$8 sps:$4 sm:$0xff]  }
  0xe0   : > { %822 = vmatprep.subr.bf16.mxu1 %v2417_v30  ;;  %v590_v59 = vld [vmem:[%s3447_s2 + $0x38] sm:$0xff]  ;;  %v2443_v60 = vcombine.high %v593_v52, %v597_v53  ;;  %v2442_v63 = vcombine.low %v593_v52, %v597_v53  ;;  %v2701_v10 = vld [vmem:[%s3463_s27 + $0x210] ss:$8 sps:$4 sm:$0xff]   ;;  %v2691_v13 = vld [vmem:[%s3463_s27 + $0x14] ss:$8 sps:$4 sm:$0xff]  }
  0xe1   : > { %2426 = vmatmul.mubr.msk.bf16.vlgmr.msra.gmra.mrb[0].mxu0 %vm695_vm0, %v3501_v18  ;;  %v2437_v62 = vcombine.high %v586_v58, %v590_v59  ;;  %v594_v1 = vld [vmem:[%s3447_s2 + $0x58] sm:$0xff]  ;;  %v2436_v4 = vcombine.low %v586_v58, %v590_v59  ;;  %v2715_v15 = vld [vmem:[%s3463_s27 + $0x234] ss:$8 sps:$4 sm:$0xff]   ;;  %v2713_v17 = vld [vmem:[%s3463_s27 + $0x230] ss:$8 sps:$4 sm:$0xff]  }
  0xe2   : > { %782 = vmatpush1.bf16.msra.mxu0 %v2414_v22  ;;  %813 = vmatprep.mubr.bf16.mxu0 %v3136_v0  ;;  %v598_v2 = vld [vmem:[%s3447_s2 + $0x78] sm:$0xff]  ;;  %v2700_v20 = vld [vmem:[%s3463_s27 + $0x34] ss:$8 sps:$4 sm:$0xff]   ;;  %v2698_v23 = vld [vmem:[%s3463_s27 + $0x30] ss:$8 sps:$4 sm:$0xff]  }
  0xe3   : > { %783 = vmatprep.subr.bf16.mxu0 %v2423_v26  ;;  %2427 = vmatmul.mubr.msk.bf16.vlgmr.msra.gmra.mrb[0].mxu1 %vm695_vm0, %v3501_v18  ;;  %v2697_v3 = vld [vmem:[%s3463_s27 + $0x204] ss:$8 sps:$4 sm:$0xff]   ;;  %v2445_v5 = vcombine.high %v594_v1, %v598_v2  ;;  %v2695_v6 = vld [vmem:[%s3463_s27 + $0x200] ss:$8 sps:$4 sm:$0xff]   ;;  %v2444_v9 = vcombine.low %v594_v1, %v598_v2  ;;  %v2727_v22 = vld [vmem:[%s3463_s27 + $0x254] ss:$8 sps:$4 sm:$0xff]  }
  0xe4   : > { %823 = vmatpush1.bf16.msra.mxu1 %v2416_v37  ;;  %854 = vmatprep.mubr.bf16.mxu1 %v3136_v0  ;;  %v2688_v7 = vld [vmem:[%s3463_s27 + $0x4] ss:$8 sps:$4 sm:$0xff]   ;;  %v2686_v12 = vld [vmem:[%s3463_s27] ss:$8 sps:$4 sm:$0xff]   ;;  %v2725_v25 = vld [vmem:[%s3463_s27 + $0x250] ss:$8 sps:$4 sm:$0xff]  }
  0xe5   : > { %824 = vmatprep.subr.bf16.mxu1 %v2425_v38  ;;  %v2709_v11 = vld [vmem:[%s3463_s27 + $0x224] ss:$8 sps:$4 sm:$0xff]   ;;  %v2707_v14 = vld [vmem:[%s3463_s27 + $0x220] ss:$8 sps:$4 sm:$0xff]   ;;  %v2712_v28 = vld [vmem:[%s3463_s27 + $0x54] ss:$8 sps:$4 sm:$0xff]  }
  0xe6   : > { %784 = vmatpush1.bf16.msra.mxu0 %v2422_v31  ;;  %v2694_v16 = vld [vmem:[%s3463_s27 + $0x24] ss:$8 sps:$4 sm:$0xff]   ;;  %v2692_v19 = vld [vmem:[%s3463_s27 + $0x20] ss:$8 sps:$4 sm:$0xff]   ;;  %v2739_v30 = vld [vmem:[%s3463_s27 + $0x274] ss:$8 sps:$4 sm:$0xff]  }
  0xe7   : > { %946 = vmatprep.subr.bf16.mxu0 %v2431_v34  ;;  %v2719_v21 = vld [vmem:[%s3463_s27 + $0x240] ss:$8 sps:$4 sm:$0xff]   ;;  %v2706_v24 = vld [vmem:[%s3463_s27 + $0x44] ss:$8 sps:$4 sm:$0xff]   ;;  %v2710_v31 = vld [vmem:[%s3463_s27 + $0x50] ss:$8 sps:$4 sm:$0xff]  }
  0xe8   : > { %825 = vmatpush1.bf16.msra.mxu1 %v2424_v45  ;;  %v2733_v26 = vld [vmem:[%s3463_s27 + $0x264] ss:$8 sps:$4 sm:$0xff]   ;;  %v2704_v27 = vld [vmem:[%s3463_s27 + $0x40] ss:$8 sps:$4 sm:$0xff]   ;;  %v2737_v33 = vld [vmem:[%s3463_s27 + $0x270] ss:$8 sps:$4 sm:$0xff]  }
  0xe9   : > { %2428 = vmatmul.mubr.msk.bf16.vlgmr.msra.gmra.mrb[4].mxu0 %vm695_vm0, %v3501_v18  ;;  %987 = vmatprep.subr.bf16.mxu1 %v2433_v47  ;;  %v2731_v29 = vld [vmem:[%s3463_s27 + $0x260] ss:$8 sps:$4 sm:$0xff]   ;;  %v2718_v32 = vld [vmem:[%s3463_s27 + $0x64] ss:$8 sps:$4 sm:$0xff]   ;;  %v2724_v35 = vld [vmem:[%s3463_s27 + $0x74] ss:$8 sps:$4 sm:$0xff]  }
  0xea   : > { %947 = vmatpush1.bf16.msra.mxu0 %v2430_v39  ;;  %978 = vmatprep.mubr.bf16.mxu0 %v3136_v0  ;;  %v2716_v34 = vld [vmem:[%s3463_s27 + $0x60] ss:$8 sps:$4 sm:$0xff]   ;;  %v2722_v36 = vld [vmem:[%s3463_s27 + $0x70] ss:$8 sps:$4 sm:$0xff]   ;;  %v2730_v37 = vld [vmem:[%s3463_s27 + $0x84] ss:$8 sps:$4 sm:$0xff]  }
  0xeb   : > { %948 = vmatprep.subr.bf16.mxu0 %v2439_v42  ;;  %2429 = vmatmul.mubr.msk.bf16.vlgmr.msra.gmra.mrb[4].mxu1 %vm695_vm0, %v3501_v18  ;;  %v2721_v18 = vld [vmem:[%s3463_s27 + $0x244] ss:$8 sps:$4 sm:$0xff]   ;;  %v2728_v38 = vld [vmem:[%s3463_s27 + $0x80] ss:$8 sps:$4 sm:$0xff]   ;;  %v2736_v39 = vld [vmem:[%s3463_s27 + $0x94] ss:$8 sps:$4 sm:$0xff]  }
  0xec   : > { %988 = vmatpush1.bf16.msra.mxu1 %v2432_v54  ;;  %1019 = vmatprep.mubr.bf16.mxu1 %v3136_v0  ;;  %v2734_v40 = vld [vmem:[%s3463_s27 + $0x90] ss:$8 sps:$4 sm:$0xff]   ;;  %v2742_v41 = vld [vmem:[%s3463_s27 + $0xa4] ss:$8 sps:$4 sm:$0xff]   ;;  %v2740_v43 = vld [vmem:[%s3463_s27 + $0xa0] ss:$8 sps:$4 sm:$0xff]  }
  0xed   : > { %989 = vmatprep.subr.bf16.mxu1 %v2441_v56  ;;  %v2745_v42 = vld [vmem:[%s3463_s27 + $0x284] ss:$8 sps:$4 sm:$0xff]   ;;  %v2743_v44 = vld [vmem:[%s3463_s27 + $0x280] ss:$8 sps:$4 sm:$0xff]   ;;  %v2746_v45 = vld [vmem:[%s3463_s27 + $0xb0] ss:$8 sps:$4 sm:$0xff]  }
  0xee   : > { %949 = vmatpush1.bf16.msra.mxu0 %v2438_v48  ;;  %v2748_v46 = vld [vmem:[%s3463_s27 + $0xb4] ss:$8 sps:$4 sm:$0xff]   ;;  %v2749_v47 = vld [vmem:[%s3463_s27 + $0x290] ss:$8 sps:$4 sm:$0xff]   ;;  %v2754_v49 = vld [vmem:[%s3463_s27 + $0xc4] ss:$8 sps:$4 sm:$0xff]  }
  0xef   : > { %1028 = vmatprep.subr.bf16.mxu0 %v2435_v51  ;;  %v2751_v48 = vld [vmem:[%s3463_s27 + $0x294] ss:$8 sps:$4 sm:$0xff]   ;;  %v2757_v50 = vld [vmem:[%s3463_s27 + $0x2a4] ss:$8 sps:$4 sm:$0xff]   ;;  %v2752_v51 = vld [vmem:[%s3463_s27 + $0xc0] ss:$8 sps:$4 sm:$0xff]  }
  0xf0   : > { %990 = vmatpush1.bf16.msra.mxu1 %v2440_v61  ;;  %v2755_v52 = vld [vmem:[%s3463_s27 + $0x2a0] ss:$8 sps:$4 sm:$0xff]   ;;  %v2758_v53 = vld [vmem:[%s3463_s27 + $0xd0] ss:$8 sps:$4 sm:$0xff]   ;;  %v2760_v54 = vld [vmem:[%s3463_s27 + $0xd4] ss:$8 sps:$4 sm:$0xff]  }
  0xf1   : > { %2446 = vmatmul.mubr.msk.bf16.vlgmr.msra.gmra.mrb[8].mxu0 %vm695_vm0, %v579_v55  ;;  %1069 = vmatprep.subr.bf16.mxu1 %v2437_v62  ;;  %v2763_v56 = vld [vmem:[%s3463_s27 + $0x2b4] ss:$8 sps:$4 sm:$0xff]   ;;  %v2769_v58 = vld [vmem:[%s3463_s27 + $0x2c4] ss:$8 sps:$4 sm:$0xff]   ;;  %v2764_v59 = vld [vmem:[%s3463_s27 + $0xe0] ss:$8 sps:$4 sm:$0xff]  }
  0xf2   : > { %1029 = vmatpush1.bf16.msra.mxu0 %v2434_v57  ;;  %1060 = vmatprep.mubr.bf16.mxu0 %v3136_v0  ;;  %v2766_v57 = vld [vmem:[%s3463_s27 + $0xe4] ss:$8 sps:$4 sm:$0xff]   ;;  %v2772_v61 = vld [vmem:[%s3463_s27 + $0xf4] ss:$8 sps:$4 sm:$0xff]   ;;  %v2773_v1 = vld [vmem:[%s3463_s27 + $0x2d0] ss:$8 sps:$4 sm:$0xff]  }
  0xf3   : > { %1030 = vmatprep.subr.bf16.mxu0 %v2443_v60  ;;  %2447 = vmatmul.mubr.msk.bf16.vlgmr.msra.gmra.mrb[8].mxu1 %vm695_vm0, %v579_v55  ;;  %v2767_v60 = vld [vmem:[%s3463_s27 + $0x2c0] ss:$8 sps:$4 sm:$0xff]   ;;  %v2775_v62 = vld [vmem:[%s3463_s27 + $0x2d4] ss:$8 sps:$4 sm:$0xff]   ;;  %v2778_v2 = vld [vmem:[%s3463_s27 + $0x104] ss:$8 sps:$4 sm:$0xff]  }
  0xf4   : > { %1070 = vmatpush1.bf16.msra.mxu1 %v2436_v4  ;;  %1101 = vmatprep.mubr.bf16.mxu1 %v3136_v0  ;;  %v2689_v0 = vld [vmem:[%s3463_s27 + $0x10] ss:$8 sps:$4 sm:$0xff]   ;;  %v2779_v4 = vld [vmem:[%s3463_s27 + $0x2e0] ss:$8 sps:$4 sm:$0xff]  }
  0xf5   : > { %1071 = vmatprep.subr.bf16.mxu1 %v2445_v5  ;;  %v2787_v5 = vld [vmem:[%s3463_s27 + $0x2f4] ss:$8 sps:$4 sm:$0xff]  }
  0xf6   : > { %1031 = vmatpush1.bf16.msra.mxu0 %v2442_v63  ;;  %v2770_v63 = vld [vmem:[%s3463_s27 + $0xf0] ss:$8 sps:$4 sm:$0xff]  }
  0xf7   : > { %2038 = vmatprep.subr.bf16.mxu0 %v2697_v3  ;;  %v2781_v3 = vld [vmem:[%s3463_s27 + $0x2e4] ss:$8 sps:$4 sm:$0xff]  }
  0xf8   : > { %1072 = vmatpush1.bf16.msra.mxu1 %v2444_v9 }
  0xf9   : > { %2448 = vmatmul.mubr.msk.bf16.vlgmr.msra.gmra.mrb[12].mxu0 %vm695_vm0, %v579_v55  ;;  %1956 = vmatprep.subr.bf16.mxu1 %v2688_v7  ;;  %v2793_v7 = vld [vmem:[%s3463_s27 + $0x304] ss:$8 sps:$4 sm:$0xff]  }
  0xfa   : > { %2039 = vmatpush1.bf16.msra.mxu0 %v2695_v6  ;;  %v2785_v6 = vld [vmem:[%s3463_s27 + $0x2f0] ss:$8 sps:$4 sm:$0xff]  }
  0xfb   : > { %2040 = vmatprep.subr.bf16.mxu0 %v2703_v8  ;;  %2449 = vmatmul.mubr.msk.bf16.vlgmr.msra.gmra.mrb[12].mxu1 %vm695_vm0, %v579_v55  ;;  %v2761_v55 = vld [vmem:[%s3463_s27 + $0x2b0] ss:$8 sps:$4 sm:$0xff]   ;;  %v1112_v8 = vlaneseq }
  0xfc   : > { %1957 = vmatpush1.bf16.msra.mxu1 %v2686_v12 }
  0xfd   : > { %1958 = vmatprep.subr.bf16.mxu1 %v2691_v13  ;;  %v3609_v9 = vshrl.u32 %v1112_v8, 7  ;;  %v2782_v8 = vld [vmem:[%s3463_s27 + $0x110] ss:$8 sps:$4 sm:$0xff]  }
  0xfe   : > { %2041 = vmatpush1.bf16.msra.mxu0 %v2701_v10 }
  0xff   : > { %2042 = vmatprep.subr.bf16.mxu0 %v2709_v11  ;;  %v1122_v10 = vsub.s32 2, %v3609_v9  ;;  %v3613_v11 = vld [vmem:[%s3461_s19] sm:$0xff]  ;;  %v1138_v13 = vsub.s32 6, %v3609_v9 }
 0x100   : > { %1959 = vmatpush1.bf16.msra.mxu1 %v2689_v0 }
 0x101   : > { %1960 = vmatprep.subr.bf16.mxu1 %v2694_v16  ;;  %v1123_v12 = vrot.slane %v3613_v11, %v1122_v10 }
 0x102   : > { %2043 = vmatpush1.bf16.msra.mxu0 %v2707_v14  ;;  %v3618_v14 = vrot.slane %v3613_v11, %v1138_v13 }
 0x103   : > { %2044 = vmatprep.subr.bf16.mxu0 %v2715_v15 }
 0x104   : > { %1961 = vmatpush1.bf16.msra.mxu1 %v2692_v19 }
 0x105   : > { %1962 = vmatprep.subr.bf16.mxu1 %v2700_v20 }
 0x106   : > { %2045 = vmatpush1.bf16.msra.mxu0 %v2713_v17 }
 0x107   : > { %2046 = vmatprep.subr.bf16.mxu0 %v2721_v18 }
 0x108   : > { %1963 = vmatpush1.bf16.msra.mxu1 %v2698_v23 }
 0x109   : > { %1964 = vmatprep.subr.bf16.mxu1 %v2706_v24 }
 0x10a   : > { %2047 = vmatpush1.bf16.msra.mxu0 %v2719_v21 }
 0x10b   : > { %2048 = vmatprep.subr.bf16.mxu0 %v2727_v22 }
 0x10c   : > { %1965 = vmatpush1.bf16.msra.mxu1 %v2704_v27  ;;  %v3624_v27 = vsub.s32 1, %v3609_v9 }
 0x10d   : > { %1966 = vmatprep.subr.bf16.mxu1 %v2712_v28 }
 0x10e   : > { %2049 = vmatpush1.bf16.msra.mxu0 %v2725_v25 }
 0x10f   : > { %2050 = vmatprep.subr.bf16.mxu0 %v2733_v26  ;;  %v3621_v26 = vsub.s32 0, %v3609_v9 }
 0x110   : > { %1967 = vmatpush1.bf16.msra.mxu1 %v2710_v31 }
 0x111   : > { %1968 = vmatprep.subr.bf16.mxu1 %v2718_v32  ;;  %v1119_v32 = vrot.slane %v3613_v11, %v3624_v27 }
 0x112   : > { %2051 = vmatpush1.bf16.msra.mxu0 %v2731_v29  ;;  %v1115_v29 = vrot.slane %v3613_v11, %v3621_v26 }
 0x113   : > { %2052 = vmatprep.subr.bf16.mxu0 %v2739_v30 }
 0x114   : > { %1969 = vmatpush1.bf16.msra.mxu1 %v2716_v34 }
 0x115   : > { %1970 = vmatprep.subr.bf16.mxu1 %v2724_v35 }
 0x116   : > { %2053 = vmatpush1.bf16.msra.mxu0 %v2737_v33 }
 0x117   : > { %2054 = vmatprep.subr.bf16.mxu0 %v2745_v42  ;;  %v1130_v42 = vsub.s32 4, %v3609_v9 }
 0x118   : > { %1971 = vmatpush1.bf16.msra.mxu1 %v2722_v36 }
 0x119   : > { %1972 = vmatprep.subr.bf16.mxu1 %v2730_v37 }
 0x11a   : > { %2055 = vmatpush1.bf16.msra.mxu0 %v2743_v44  ;;  %v1134_v44 = vsub.s32 5, %v3609_v9 }
 0x11b   : > { %2056 = vmatprep.subr.bf16.mxu0 %v2751_v48 }
 0x11c   : > { %1973 = vmatpush1.bf16.msra.mxu1 %v2728_v38 }
 0x11d   : > { %1974 = vmatprep.subr.bf16.mxu1 %v2736_v39  ;;  %v1126_v39 = vsub.s32 3, %v3609_v9 }
 0x11e   : > { %2057 = vmatpush1.bf16.msra.mxu0 %v2749_v47 }
 0x11f   : > { %2058 = vmatprep.subr.bf16.mxu0 %v2757_v50  ;;  %v1127_v48 = vrot.slane %v3613_v11, %v1126_v39  ;;  %v2811_v39 = vld [vmem:[%s3463_s27 + $0x334] ss:$8 sps:$4 sm:$0xff]  }
 0x120   : > { %1975 = vmatpush1.bf16.msra.mxu1 %v2734_v40 }
 0x121   : > { %1976 = vmatprep.subr.bf16.mxu1 %v2742_v41 }
 0x122   : > { %2059 = vmatpush1.bf16.msra.mxu0 %v2755_v52 }
 0x123   : > { %2060 = vmatprep.subr.bf16.mxu0 %v2763_v56 }
 0x124   : > { %1977 = vmatpush1.bf16.msra.mxu1 %v2740_v43 }
 0x125   : > { %1978 = vmatprep.subr.bf16.mxu1 %v2748_v46 }
 0x126   : > { %2061 = vmatpush1.bf16.msra.mxu0 %v2761_v55  ;;  %v2776_v55 = vld [vmem:[%s3463_s27 + $0x100] ss:$8 sps:$4 sm:$0xff]  }
 0x127   : > { %2062 = vmatprep.subr.bf16.mxu0 %v2769_v58 }
 0x128   : > { %1979 = vmatpush1.bf16.msra.mxu1 %v2746_v45 }
 0x129   : > { %1980 = vmatprep.subr.bf16.mxu1 %v2754_v49  ;;  %v1131_v49 = vrot.slane %v3613_v11, %v1130_v42  ;;  %v2814_v42 = vld [vmem:[%s3463_s27 + $0x164] ss:$8 sps:$4 sm:$0xff]  }
 0x12a   : > { %2063 = vmatpush1.bf16.msra.mxu0 %v2767_v60 }
 0x12b   : > { %2064 = vmatprep.subr.bf16.mxu0 %v2775_v62 }
 0x12c   : > { %1981 = vmatpush1.bf16.msra.mxu1 %v2752_v51 }
 0x12d   : > { %1982 = vmatprep.subr.bf16.mxu1 %v2760_v54  ;;  %v1135_v54 = vrot.slane %v3613_v11, %v1134_v44  ;;  %v2812_v44 = vld [vmem:[%s3463_s27 + $0x160] ss:$8 sps:$4 sm:$0xff]  }
 0x12e   : > { %2065 = vmatpush1.bf16.msra.mxu0 %v2773_v1 }
 0x12f   : > { %2066 = vmatprep.subr.bf16.mxu0 %v2781_v3 }
 0x130   : > { %1983 = vmatpush1.bf16.msra.mxu1 %v2758_v53 }
 0x131   : > { %1984 = vmatprep.subr.bf16.mxu1 %v2766_v57 }
 0x132   : > { %2067 = vmatpush1.bf16.msra.mxu0 %v2779_v4  ;;  %v1142_v4 = vsub.s32 7, %v3609_v9 }
 0x133   : > { %2068 = vmatprep.subr.bf16.mxu0 %v2787_v5 }
 0x134   : > { %1985 = vmatpush1.bf16.msra.mxu1 %v2764_v59 }
 0x135   : > { %1986 = vmatprep.subr.bf16.mxu1 %v2772_v61  ;;  %v2784_v61 = vld [vmem:[%s3463_s27 + $0x114] ss:$8 sps:$4 sm:$0xff]  }
 0x136   : > { %2069 = vmatpush1.bf16.msra.mxu0 %v2785_v6 }
 0x137   : > { %2079 = vmatprep.subr.bf16.mxu0 %v2793_v7 }
 0x138   : > { %1987 = vmatpush1.bf16.msra.mxu1 %v2770_v63 }
 0x139   : > { %1997 = vmatprep.subr.bf16.mxu1 %v2778_v2 }
 0x1b4   : > { %v733_v15 = vpop.f32.mrb[0].mxu0 }
 0x1b5   : > { %v735_v0 = vpop.f32.mrb[1].mxu0 }
 0x1b6   : > { %v737_v16 = vpop.f32.mrb[2].mxu0  ;;  %v774_v18 = vpop.f32.mrb[0].mxu1 }
 0x1b7   : > { %v738_v17 = vpop.f32.mrb[3].mxu0  ;;  %v776_v19 = vpop.f32.mrb[1].mxu1 }
 0x1b8   : > { %v778_v21 = vpop.f32.mrb[2].mxu1  ;;  %v1143_v17 = vrot.slane %v3613_v11, %v1142_v4  ;;  %v2850_v4 = vld [vmem:[%s3463_s27 + $0x1c4] ss:$8 sps:$4 sm:$0xff]  }
 0x1b9   : > { %v779_v23 = vpop.f32.mrb[3].mxu1  ;;  %v2791_v21 = vld [vmem:[%s3463_s27 + $0x300] ss:$8 sps:$4 sm:$0xff]  }
 0x1bc   : > { %v815_v20 = vpop.f32.mrb[4].mxu0 }
 0x1bd   : > { %v817_v22 = vpop.f32.mrb[5].mxu0 }
 0x1be   : > { %v819_v24 = vpop.f32.mrb[6].mxu0  ;;  %v856_v28 = vpop.f32.mrb[4].mxu1 }
 0x1bf   : > { %v820_v25 = vpop.f32.mrb[7].mxu0  ;;  %v858_v30 = vpop.f32.mrb[5].mxu1 }
 0x1c0   : > { %v860_v33 = vpop.f32.mrb[6].mxu1  ;;  %v2796_v25 = vld [vmem:[%s3463_s27 + $0x134] ss:$8 sps:$4 sm:$0xff]  }
 0x1c1   : > { %v861_v36 = vpop.f32.mrb[7].mxu1 }
 0x1c2   : > { %v2800_v36 = vld [vmem:[%s3463_s27 + $0x140] ss:$8 sps:$4 sm:$0xff]  }
 0x1c4   : > { %v980_v31 = vpop.f32.mrb[8].mxu0 }
 0x1c5   : > { %v981_v34 = vadd.f32 %v980_v31, %v733_v15  ;;  %v982_v35 = vpop.f32.mrb[9].mxu0 }
 0x1c6   : > { %v983_v37 = vadd.f32 %v982_v35, %v735_v0  ;;  %v984_v38 = vpop.f32.mrb[10].mxu0  ;;  %v1021_v47 = vpop.f32.mrb[8].mxu1 }
 0x1c7   : > { %v1152_v40 = vadd.f32 %v1115_v29, %v981_v34  ;;  %v985_v41 = vpop.f32.mrb[11].mxu0  ;;  %v1022_v50 = vadd.f32 %v1021_v47, %v774_v18  ;;  %v1023_v51 = vpop.f32.mrb[9].mxu1  ;;  %v2799_v29 = vld [vmem:[%s3463_s27 + $0x314] ss:$8 sps:$4 sm:$0xff]   ;;  %v2802_v34 = vld [vmem:[%s3463_s27 + $0x144] ss:$8 sps:$4 sm:$0xff]  }
 0x1c8   : > { %v1153_v43 = vadd.f32 %v1119_v32, %v983_v37  ;;  %v1024_v56 = vadd.f32 %v1023_v51, %v776_v19  ;;  %v1025_v57 = vpop.f32.mrb[10].mxu1  ;;  %v2797_v32 = vld [vmem:[%s3463_s27 + $0x310] ss:$8 sps:$4 sm:$0xff]   ;;  %v2803_v37 = vld [vmem:[%s3463_s27 + $0x320] ss:$8 sps:$4 sm:$0xff]  }
 0x1c9   : > { %v1160_v45 = vmax.f32 %v1152_v40, 0.0  ;;  %v3638_v62 = vadd.f32 %v1123_v12, %v1022_v50  ;;  %v1026_v63 = vpop.f32.mrb[11].mxu1  ;;  %v2790_v12 = vld [vmem:[%s3463_s27 + $0x124] ss:$8 sps:$4 sm:$0xff]   ;;  %v2808_v38 = vld [vmem:[%s3463_s27 + $0x154] ss:$8 sps:$4 sm:$0xff]  }
 0x1ca   : > { %v1161_v46 = vmax.f32 %v1153_v43, 0.0  ;;  %v1155_v3 = vadd.f32 %v1127_v48, %v1024_v56  ;;  %v2806_v40 = vld [vmem:[%s3463_s27 + $0x150] ss:$8 sps:$4 sm:$0xff]   ;;  %v2817_v43 = vld [vmem:[%s3463_s27 + $0x344] ss:$8 sps:$4 sm:$0xff]  }
 0x1cb   : > { %v1168_v58 = vpack.c.bf16 %v1160_v45, %v1160_v45  ;;  %v2809_v41 = vld [vmem:[%s3463_s27 + $0x330] ss:$8 sps:$4 sm:$0xff]   ;;  %v2815_v45 = vld [vmem:[%s3463_s27 + $0x340] ss:$8 sps:$4 sm:$0xff]   ;;  %v2823_v47 = vld [vmem:[%s3463_s27 + $0x354] ss:$8 sps:$4 sm:$0xff]  }
 0x1cc   : > { %v1169_v52 = vpack.c.bf16 %v1161_v46, %v1161_v46  ;;  %v1062_v53 = vpop.f32.mrb[12].mxu0  ;;  %v1163_v10 = vmax.f32 %v1155_v3, 0.0  ;;  %v2820_v46 = vld [vmem:[%s3463_s27 + $0x174] ss:$8 sps:$4 sm:$0xff]   ;;  %v2818_v48 = vld [vmem:[%s3463_s27 + $0x170] ss:$8 sps:$4 sm:$0xff]  }
 0x1cd   : > { %v1063_v59 = vadd.f32 %v1062_v53, %v815_v20  ;;  %v1064_v60 = vpop.f32.mrb[13].mxu0  ;;  %v2788_v20 = vld [vmem:[%s3463_s27 + $0x120] ss:$8 sps:$4 sm:$0xff]   ;;  %v2826_v50 = vld [vmem:[%s3463_s27 + $0x184] ss:$8 sps:$4 sm:$0xff]  }
 0x1ce   : > { %v1065_v1 = vadd.f32 %v1064_v60, %v817_v22  ;;  %v1066_v2 = vpop.f32.mrb[14].mxu0  ;;  %1988 = vmatprep.mubr.bf16.mxu1 %v1169_v52  ;;  %v1171_v0 = vpack.c.bf16 %v1163_v10, %v1163_v10  ;;  %v1103_v16 = vpop.f32.mrb[12].mxu1  ;;  %v2829_v51 = vld [vmem:[%s3463_s27 + $0x364] ss:$8 sps:$4 sm:$0xff]   ;;  %v2824_v52 = vld [vmem:[%s3463_s27 + $0x180] ss:$8 sps:$4 sm:$0xff]  }
 0x1cf   : > { %v1156_v5 = vadd.f32 %v1131_v49, %v1063_v59  ;;  %v1067_v6 = vpop.f32.mrb[15].mxu0  ;;  %1989 = vmatmul.mubr.bf16.vlgmr.msra.gmra.mrb[16].mxu1 %v1168_v58  ;;  %v1104_v9 = vadd.f32 %v1103_v16, %v856_v28  ;;  %v1105_v18 = vpop.f32.mrb[13].mxu1  ;;  %v2821_v49 = vld [vmem:[%s3463_s27 + $0x350] ss:$8 sps:$4 sm:$0xff]   ;;  %v2827_v53 = vld [vmem:[%s3463_s27 + $0x360] ss:$8 sps:$4 sm:$0xff]  }
 0x1d0   : > { %v1157_v7 = vadd.f32 %v1135_v54, %v1065_v1  ;;  %1998 = vmatpush1.bf16.msra.mxu1 %v2776_v55  ;;  %v1106_v22 = vadd.f32 %v1105_v18, %v858_v30  ;;  %2029 = vmatprep.mubr.bf16.mxu1 %v1171_v0  ;;  %v1107_v23 = vpop.f32.mrb[14].mxu1  ;;  %v2794_v30 = vld [vmem:[%s3463_s27 + $0x130] ss:$8 sps:$4 sm:$0xff]   ;;  %v2832_v54 = vld [vmem:[%s3463_s27 + $0x194] ss:$8 sps:$4 sm:$0xff]  }
 0x1d1   : > { %v1164_v13 = vmax.f32 %v1156_v5, 0.0  ;;  %1999 = vmatprep.subr.bf16.mxu1 %v2784_v61  ;;  %v3649_v31 = vadd.f32 %v3618_v14, %v1104_v9  ;;  %v1108_v11 = vpop.f32.mrb[15].mxu1  ;;  %v2805_v14 = vld [vmem:[%s3463_s27 + $0x324] ss:$8 sps:$4 sm:$0xff]   ;;  %v2835_v55 = vld [vmem:[%s3463_s27 + $0x374] ss:$8 sps:$4 sm:$0xff]  }
 0x1d2   : > { %v1165_v15 = vmax.f32 %v1157_v7, 0.0  ;;  %v1159_v28 = vadd.f32 %v1143_v17, %v1106_v22  ;;  %v2830_v56 = vld [vmem:[%s3463_s27 + $0x190] ss:$8 sps:$4 sm:$0xff]   ;;  %v2838_v58 = vld [vmem:[%s3463_s27 + $0x1a4] ss:$8 sps:$4 sm:$0xff]  }
 0x1d3   : > { %v1172_v24 = vpack.c.bf16 %v1164_v13, %v1164_v13  ;;  %v2833_v57 = vld [vmem:[%s3463_s27 + $0x370] ss:$8 sps:$4 sm:$0xff]   ;;  %v2841_v59 = vld [vmem:[%s3463_s27 + $0x384] ss:$8 sps:$4 sm:$0xff]   ;;  %v2836_v60 = vld [vmem:[%s3463_s27 + $0x1a0] ss:$8 sps:$4 sm:$0xff]  }
 0x1d4   : > { %v1173_v19 = vpack.c.bf16 %v1165_v15, %v1165_v15  ;;  %2000 = vmatpush1.bf16.msra.mxu1 %v2782_v8  ;;  %v1167_v33 = vmax.f32 %v1159_v28, 0.0  ;;  %v2839_v61 = vld [vmem:[%s3463_s27 + $0x380] ss:$8 sps:$4 sm:$0xff]   ;;  %v2844_v63 = vld [vmem:[%s3463_s27 + $0x1b4] ss:$8 sps:$4 sm:$0xff]   ;;  %v1166_v11 = vmax.f32 %v3649_v31, 0.0 }
 0x1d5   : > { %2001 = vmatprep.subr.bf16.mxu1 %v2790_v12  ;;  %v2847_v1 = vld [vmem:[%s3463_s27 + $0x394] ss:$8 sps:$4 sm:$0xff]   ;;  %v2842_v2 = vld [vmem:[%s3463_s27 + $0x1b0] ss:$8 sps:$4 sm:$0xff]   ;;  %v2853_v5 = vld [vmem:[%s3463_s27 + $0x3a4] ss:$8 sps:$4 sm:$0xff]  }
 0x1d6   : > { %2070 = vmatprep.mubr.bf16.mxu0 %v1173_v19  ;;  %v1175_v35 = vpack.c.bf16 %v1167_v33, %v1167_v33  ;;  %v2845_v3 = vld [vmem:[%s3463_s27 + $0x390] ss:$8 sps:$4 sm:$0xff]   ;;  %v2848_v6 = vld [vmem:[%s3463_s27 + $0x1c0] ss:$8 sps:$4 sm:$0xff]   ;;  %v2856_v8 = vld [vmem:[%s3463_s27 + $0x1d4] ss:$8 sps:$4 sm:$0xff]   ;;  %v1174_v28 = vpack.c.bf16 %v1166_v11, %v1166_v11 }
 0x1d7   : > { %2071 = vmatmul.mubr.bf16.vlgmr.msra.gmra.mrb[16].mxu0 %v1172_v24  ;;  %v2851_v7 = vld [vmem:[%s3463_s27 + $0x3a0] ss:$8 sps:$4 sm:$0xff]   ;;  %v2859_v10 = vld [vmem:[%s3463_s27 + $0x3b4] ss:$8 sps:$4 sm:$0xff]   ;;  %v2854_v13 = vld [vmem:[%s3463_s27 + $0x1d0] ss:$8 sps:$4 sm:$0xff]  }
 0x1d8   : > { %2002 = vmatpush1.bf16.msra.mxu1 %v2788_v20  ;;  %2080 = vmatpush1.bf16.msra.mxu0 %v2791_v21  ;;  %v2857_v12 = vld [vmem:[%s3463_s27 + $0x3b0] ss:$8 sps:$4 sm:$0xff]   ;;  %v2862_v15 = vld [vmem:[%s3463_s27 + $0x1e4] ss:$8 sps:$4 sm:$0xff]   ;;  %v2860_v16 = vld [vmem:[%s3463_s27 + $0x1e0] ss:$8 sps:$4 sm:$0xff]  }
 0x1d9   : > { %2003 = vmatprep.subr.bf16.mxu1 %v2796_v25  ;;  %2081 = vmatprep.subr.bf16.mxu0 %v2799_v29  ;;  %v2865_v0 = vld [vmem:[%s3463_s27 + $0x3c4] ss:$8 sps:$4 sm:$0xff]   ;;  %v2863_v17 = vld [vmem:[%s3463_s27 + $0x3c0] ss:$8 sps:$4 sm:$0xff]   ;;  %v2868_v9 = vld [vmem:[%s3463_s27 + $0x1f4] ss:$8 sps:$4 sm:$0xff]  }
 0x1da   : > { %2111 = vmatprep.mubr.bf16.mxu0 %v1175_v35  ;;  %v2871_v18 = vld [vmem:[%s3463_s27 + $0x3d4] ss:$8 sps:$4 sm:$0xff]   ;;  %v2866_v19 = vld [vmem:[%s3463_s27 + $0x1f0] ss:$8 sps:$4 sm:$0xff]   ;;  %v1162_v21 = vmax.f32 %v3638_v62, 0.0 }
 0x1db   : > { %v2869_v20 = vld [vmem:[%s3463_s27 + $0x3d0] ss:$8 sps:$4 sm:$0xff]   ;;  %v2874_v22 = vld [vmem:[%s3463_s27 + $0x3e4] ss:$8 sps:$4 sm:$0xff]   ;;  %v2872_v23 = vld [vmem:[%s3463_s27 + $0x3e0] ss:$8 sps:$4 sm:$0xff]  }
 0x1dc   : > { %2004 = vmatpush1.bf16.msra.mxu1 %v2794_v30  ;;  %2082 = vmatpush1.bf16.msra.mxu0 %v2797_v32  ;;  %v1170_v24 = vpack.c.bf16 %v1162_v21, %v1162_v21  ;;  %v2877_v25 = vld [vmem:[%s3463_s27 + $0x3f4] ss:$8 sps:$4 sm:$0xff]   ;;  %v2875_v29 = vld [vmem:[%s3463_s27 + $0x3f0] ss:$8 sps:$4 sm:$0xff]   ;;  %v1304_v62 = vld [vmem:[%s3469_s26] sm:$0x3] }
 0x1dd   : > { %2005 = vmatprep.subr.bf16.mxu1 %v2802_v34  ;;  %2083 = vmatprep.subr.bf16.mxu0 %v2805_v14  ;;  %v1309_v34 = vrot.slane %v1304_v62, %v3621_v26  ;;  %v1313_v35 = vrot.slane %v1304_v62, %v3624_v27 }
 0x1e0   : > { %2006 = vmatpush1.bf16.msra.mxu1 %v2800_v36  ;;  %2084 = vmatpush1.bf16.msra.mxu0 %v2803_v37  ;;  %v2122_v36 = vld [vmem:[%s3471_s23] sm:$0x3] }
 0x1e1   : > { %2007 = vmatprep.subr.bf16.mxu1 %v2808_v38  ;;  %2085 = vmatprep.subr.bf16.mxu0 %v2811_v39 }
 0x1e4   : > { %2008 = vmatpush1.bf16.msra.mxu1 %v2806_v40  ;;  %2086 = vmatpush1.bf16.msra.mxu0 %v2809_v41  ;;  %v2127_v41 = vrot.slane %v2122_v36, %v3621_v26  ;;  %v2578_v26 = vld [vmem:[%s569_s29] ss:$0 sm:$0xff] }
 0x1e5   : > { %2009 = vmatprep.subr.bf16.mxu1 %v2814_v42  ;;  %2087 = vmatprep.subr.bf16.mxu0 %v2817_v43 }
 0x1e8   : > { %2010 = vmatpush1.bf16.msra.mxu1 %v2812_v44  ;;  %2088 = vmatpush1.bf16.msra.mxu0 %v2815_v45  ;;  %v2131_v44 = vrot.slane %v2122_v36, %v3624_v27 }
 0x1e9   : > { %2011 = vmatprep.subr.bf16.mxu1 %v2820_v46  ;;  %2089 = vmatprep.subr.bf16.mxu0 %v2823_v47 }
 0x1ec   : > { %2012 = vmatpush1.bf16.msra.mxu1 %v2818_v48  ;;  %2090 = vmatpush1.bf16.msra.mxu0 %v2821_v49 }
 0x1ed   : > { %2013 = vmatprep.subr.bf16.mxu1 %v2826_v50  ;;  %2091 = vmatprep.subr.bf16.mxu0 %v2829_v51 }
 0x1f0   : > { %2014 = vmatpush1.bf16.msra.mxu1 %v2824_v52  ;;  %2092 = vmatpush1.bf16.msra.mxu0 %v2827_v53 }
 0x1f1   : > { %2015 = vmatprep.subr.bf16.mxu1 %v2832_v54  ;;  %2093 = vmatprep.subr.bf16.mxu0 %v2835_v55 }
 0x1f4   : > { %2016 = vmatpush1.bf16.msra.mxu1 %v2830_v56  ;;  %2094 = vmatpush1.bf16.msra.mxu0 %v2833_v57 }
 0x1f5   : > { %2017 = vmatprep.subr.bf16.mxu1 %v2838_v58  ;;  %2095 = vmatprep.subr.bf16.mxu0 %v2841_v59 }
 0x1f8   : > { %2018 = vmatpush1.bf16.msra.mxu1 %v2836_v60  ;;  %2096 = vmatpush1.bf16.msra.mxu0 %v2839_v61 }
 0x1f9   : > { %2019 = vmatprep.subr.bf16.mxu1 %v2844_v63  ;;  %2097 = vmatprep.subr.bf16.mxu0 %v2847_v1 }
 0x1fc   : > { %2020 = vmatpush1.bf16.msra.mxu1 %v2842_v2  ;;  %2098 = vmatpush1.bf16.msra.mxu0 %v2845_v3 }
 0x1fd   : > { %2021 = vmatprep.subr.bf16.mxu1 %v2850_v4  ;;  %2099 = vmatprep.subr.bf16.mxu0 %v2853_v5 }
 0x200   : > { %2022 = vmatpush1.bf16.msra.mxu1 %v2848_v6  ;;  %2100 = vmatpush1.bf16.msra.mxu0 %v2851_v7 }
 0x201   : > { %2023 = vmatprep.subr.bf16.mxu1 %v2856_v8  ;;  %2101 = vmatprep.subr.bf16.mxu0 %v2859_v10 }
 0x204   : > { %2024 = vmatpush1.bf16.msra.mxu1 %v2854_v13  ;;  %2102 = vmatpush1.bf16.msra.mxu0 %v2857_v12 }
 0x205   : > { %2025 = vmatprep.subr.bf16.mxu1 %v2862_v15  ;;  %2103 = vmatprep.subr.bf16.mxu0 %v2865_v0 }
 0x208   : > { %2026 = vmatpush1.bf16.msra.mxu1 %v2860_v16  ;;  %2104 = vmatpush1.bf16.msra.mxu0 %v2863_v17 }
 0x209   : > { %2027 = vmatprep.subr.bf16.mxu1 %v2868_v9  ;;  %2105 = vmatprep.subr.bf16.mxu0 %v2871_v18 }
 0x20c   : > { %2028 = vmatpush1.bf16.msra.mxu1 %v2866_v19  ;;  %2106 = vmatpush1.bf16.msra.mxu0 %v2869_v20 }
 0x20d   : > { %2107 = vmatprep.subr.bf16.mxu0 %v2874_v22 }
 0x20f   : > { %2030 = vmatmul.mubr.bf16.vlgmr.msra.gmra.mrb[16].mxu1 %v1170_v24 }
 0x210   : > { %2108 = vmatpush1.bf16.msra.mxu0 %v2872_v23 }
 0x211   : > { %2109 = vmatprep.subr.bf16.mxu0 %v2877_v25 }
 0x214   : > { %2110 = vmatpush1.bf16.msra.mxu0 %v2875_v29 }
 0x217   : > { %2112 = vmatmul.mubr.bf16.vlgmr.msra.gmra.mrb[16].mxu0 %v1174_v28 }
 0x2e2   : > { %v2031_v30 = vpop.f32.mrb[16].mxu1 }
 0x2e3   : > { %v2033_v32 = vpop.f32.mrb[17].mxu1  ;;  %v2589_v37 = vadd.f32 %v2031_v30, %v1309_v34 }
 0x2e4   : > { %v2035_v33 = vpop.f32.mrb[18].mxu1  ;;  %v2591_v38 = vadd.f32 %v2033_v32, %v1313_v35 }
 0x2e5   : > { %v2036_v14 = vpop.f32.mrb[19].mxu1 }
 0x2ea   : > { %v2113_v39 = vpop.f32.mrb[16].mxu0 }
 0x2eb   : > { %v2590_v40 = vadd.f32 %v2589_v37, %v2113_v39  ;;  %v2115_v31 = vpop.f32.mrb[17].mxu0 }
 0x2ec   : > { %v2592_v42 = vadd.f32 %v2591_v38, %v2115_v31  ;;  %v2117_v43 = vpop.f32.mrb[18].mxu0 }
 0x2ed   : > { %v2120_v45 = vmax.f32 %v2590_v40, 0.0  ;;  %v2118_v46 = vpop.f32.mrb[19].mxu0 }
 0x2ee   : > { %v2121_v47 = vmax.f32 %v2592_v42, 0.0 }
 0x2ef   : > { %v2134_v48 = vmul.f32 %v2127_v41, %v2120_v45 }
 0x2f0   : > { %v2135_v49 = vmul.f32 %v2131_v44, %v2121_v47 }
 0x2f1   : > { %v2137_v50 = vsel %vm2136_vm1, %v2134_v48, 0.0 }
 0x2f2   : > { %v2138_v51 = vsel %vm2136_vm1, %v2135_v49, 0.0 }
 0x2f3   : > { %v2139_v52 = vadd.f32 %v2138_v51, %v2137_v50 }
 0x2f5   : > { %2140 = vadd.xlane.f32.xlu0 %v2139_v52 }
 0x382   : > { %v2141_v53 = vpop.xlane.xlu0 %2140 }
 0x383   : > { %v2149_v54 = vadd.f32 %v2578_v26, %v2141_v53 }
 0x385   : > { %v2579_v55 = vmul.f32 -1.442695, %v2149_v54 }
 0x387   : > { %2878 = vpow2.f32 %v2579_v55 }
 0x391   : > { %v2879_v27 = vpop.eup %2878 }
 0x392   : > { %v2153_v56 = vadd.f32 1.0, %v2879_v27 }
 0x394   : > { %2880 = vrcp.f32 %v2153_v56 }
 0x39e   : > { %v2881_v57 = vpop.eup %2880 }
 0x39f   : > { %2157 = vst.msk [vmem:[%s576_s1] sm:$0x3] %vm2156_vm2, %v2881_v57 }
 0x3a0 PF: > { %s30_s10 = sadd.s32 1, %s3124_s10   ;;  %s3790_s8 = sld [smem:[#allocation16_spill]] }
 0x3a1   : > { %p27_p1 = scmp.ge.s32.totalorder %s30_s10, 5   ;;  %s3791_s29 = sld [smem:[#allocation18_spill]] }
 0x3a2   : > { %s3792_s22 = sld [smem:[#allocation17_spill]]  ;;  %s3793_s27 = smov %s3108_s28 }
 0x3a3   : > { %s3795_s30 = smov %s3120_s9  ;;  %29 = sbr.rel (!%p27_p1) target bundleno = 17 (0x11), region = 160 }
 0x3a6   : > { %s3794_s28 = smov %s3790_s8 }
 0x3a8   : > { %s3796_s9 = smov %s3792_s22 }
 0x3aa   :  { %2183 = vsyncpa [#allocation3], 1 }
 0x3ab   :  { %2185 = vsyncpa [#allocation3 + $0x1], 1 }
 0x3ac   :  { %2186 = vsyncpa [#allocation5], 1 }
 0x3ad   :  { %2188 = vsyncpa [#allocation5 + $0x1], 1 }
 0x3ae   :  { %2189 = vsyncpa [#allocation8], 1 }
 0x3af   :  { %2191 = vsyncpa [#allocation8 + $0x1], 1 }
 0x3b0   :  { %2192 = vsyncpa [#allocation11], 1 }
 0x3b1   :  { %2194 = vsyncpa [#allocation11 + $0x1], 1 }

</bundles_post_ra>
